<compile_context>
chip_gen: v7x
topology: tpu7x:2x2x1
jax: 0.10.0
libtpu: 0.0.40
codegen_flags: <defaults>
</compile_context>

<pallas_src>
import functools

import numpy as np
import jax
import jax.numpy as jnp
from jax.experimental import pallas as pl
from jax.experimental.pallas import tpu as pltpu

ITEM_FEAT_DIM = 2
PATTERN_FEAT_DIM = 3
HIDDEN_DIM = 32
MP_ROUNDS = 2


def _round_up(x, k):
    return ((x + k - 1) // k) * k


def _gnn_pair_kernel(const_ref, feat_ref, out_ref, *, hidden, fi, fp, n, m,
                     p_pad, r_adj, r_adjt, r_sel, rounds):
    f32 = jnp.float32
    H = hidden
    relu = lambda x: jnp.maximum(x, 0.0)

    # ---- unpack the packed constant slab (static slices, read once) ----
    w1T    = const_ref[0:H, 0:2 * H]                 # [H, 2H] fused scorer weight
    w_i2pT = const_ref[0:H, 2 * H:3 * H]             # [H, H] (out, in)
    w_p2iT = const_ref[0:H, 3 * H:4 * H]             # [H, H]
    c0 = 4 * H
    w_ieT  = const_ref[0:H, c0:c0 + fi]              # [H, fi]
    w_peT  = const_ref[0:H, c0 + fi:c0 + fi + fp]    # [H, fp]
    c1 = c0 + fi + fp
    b_ie   = const_ref[0:H, c1 + 0:c1 + 1]           # [H, 1] bias columns
    b_pe   = const_ref[0:H, c1 + 1:c1 + 2]
    b_i2p  = const_ref[0:H, c1 + 2:c1 + 3]
    b_p2i  = const_ref[0:H, c1 + 3:c1 + 4]
    b1     = const_ref[0:H, c1 + 4:c1 + 5]
    w2     = const_ref[0:H, c1 + 5:c1 + 6]           # [H, 1] final projection
    b2     = const_ref[0:1, c1 + 6:c1 + 7]           # [1, 1]
    adj    = const_ref[r_adj:r_adj + m, 0:n]         # [m, n] edge counts
    adjt   = const_ref[r_adjt:r_adjt + n, 0:m]       # [n, m] transposed counts
    sel    = const_ref[r_sel:r_sel + n, 0:2 * p_pad]  # [n, 2*p_pad] fused gather

    item_T = feat_ref[0:fi, 0:n]                     # [fi, n]
    pat_T  = feat_ref[fi:fi + fp, 0:m]               # [fp, m]

    # ---- node embeddings on the VPU (K=2/3: skip MXU fill/drain) ----
    acc_i = w_ieT[:, 0:1] * item_T[0:1, :]
    for k in range(1, fi):
        acc_i = acc_i + w_ieT[:, k:k + 1] * item_T[k:k + 1, :]
    h_item = relu(acc_i + b_ie)                      # [H, n]

    acc_p = w_peT[:, 0:1] * pat_T[0:1, :]
    for k in range(1, fp):
        acc_p = acc_p + w_peT[:, k:k + 1] * pat_T[k:k + 1, :]
    h_pat = relu(acc_p + b_pe)                       # [H, m]

    # ---- message passing (transposed [H, nodes] layout).  Adjacency
    #      contractions are VPU broadcast outer-product MACs; only the
    #      [H, H] weight dots hit the MXU. ----
    for _ in range(rounds):
        # p_msg_T = h_item_T @ adj_T  (scatter-add over edges in the reference)
        p_msg = h_item[:, 0:1] * adjt[0:1, :]
        for i in range(1, n):
            p_msg = p_msg + h_item[:, i:i + 1] * adjt[i:i + 1, :]   # [H, m]
        p_msg = relu(jnp.dot(w_i2pT, p_msg, preferred_element_type=f32) + b_i2p)
        h_pat = relu(h_pat + p_msg)

        # i_msg_T = h_pat_T @ adj
        i_msg = h_pat[:, 0:1] * adj[0:1, :]
        for p in range(1, m):
            i_msg = i_msg + h_pat[:, p:p + 1] * adj[p:p + 1, :]     # [H, n]
        i_msg = relu(jnp.dot(w_p2iT, i_msg, preferred_element_type=f32) + b_p2i)
        h_item = relu(h_item + i_msg)

    # ---- pair scorer: one fused gather dot, one fused K=2H dot ----
    h_sel = jnp.dot(h_item, sel, preferred_element_type=f32)        # [H, 2*p_pad]
    e_cat = jnp.concatenate(
        [h_sel[:, 0:p_pad], h_sel[:, p_pad:2 * p_pad]], axis=0)     # [2H, p_pad]
    z = relu(jnp.dot(w1T, e_cat, preferred_element_type=f32) + b1)  # [H, p_pad]

    # H -> 1 projection as a sublane reduction; broadcast to a full (8, p_pad)
    # tile so the output store is unmasked and lane/sublane dense.
    score = jnp.sum(w2 * z, axis=0, keepdims=True) + b2             # [1, p_pad]
    out_ref[...] = jnp.broadcast_to(score, out_ref.shape)


def init_params(key, hidden=HIDDEN_DIM):
    """Deterministic synthetic parameters (PyTorch Linear: y = x W^T + b).
    Stored as [in, out] matrices; biases as [1, out]."""
    ks = jax.random.split(key, 12)

    def lin(kw, kb, fin, fout, scale=0.1):
        w = scale * jax.random.normal(kw, (fin, fout), jnp.float32)
        b = scale * jax.random.normal(kb, (1, fout), jnp.float32)
        return w, b

    p = {}
    p["w_ie"], p["b_ie"] = lin(ks[0], ks[1], ITEM_FEAT_DIM, hidden)
    p["w_pe"], p["b_pe"] = lin(ks[2], ks[3], PATTERN_FEAT_DIM, hidden)
    p["w_i2p"], p["b_i2p"] = lin(ks[4], ks[5], hidden, hidden)
    p["w_p2i"], p["b_p2i"] = lin(ks[6], ks[7], hidden, hidden)
    w1, p["b1"] = lin(ks[8], ks[9], 2 * hidden, hidden)
    p["w1a"], p["w1b"] = w1[:hidden], w1[hidden:]   # split concat([h_i,h_j]) matmul
    p["w2"], p["b2"] = lin(ks[10], ks[11], hidden, 1)
    return p


def _build_const_slab(params_np, edges, candidate_pairs, n, m, hidden, fi, fp, p_pad):
    """Pure host-side numpy: one lane-dense slab holding every constant."""
    H = hidden
    r_adj = _round_up(H, 8)
    r_adjt = r_adj + _round_up(m, 8)
    r_sel = r_adjt + _round_up(n, 8)
    rows = r_sel + _round_up(n, 8)
    width = max(2 * p_pad, _round_up(4 * H + fi + fp + 7, 128),
                _round_up(max(n, m), 128))
    slab = np.zeros((rows, width), np.float32)

    # fused scorer weight W1 = [H_out, 2H_in]  (z = W1 @ cat(h_i, h_j) + b1)
    slab[0:H, 0:H] = params_np["w1a"].T
    slab[0:H, H:2 * H] = params_np["w1b"].T
    slab[0:H, 2 * H:3 * H] = params_np["w_i2p"].T
    slab[0:H, 3 * H:4 * H] = params_np["w_p2i"].T
    c0 = 4 * H
    slab[0:H, c0:c0 + fi] = params_np["w_ie"].T
    slab[0:H, c0 + fi:c0 + fi + fp] = params_np["w_pe"].T
    c1 = c0 + fi + fp
    slab[0:H, c1 + 0] = params_np["b_ie"][0]
    slab[0:H, c1 + 1] = params_np["b_pe"][0]
    slab[0:H, c1 + 2] = params_np["b_i2p"][0]
    slab[0:H, c1 + 3] = params_np["b_p2i"][0]
    slab[0:H, c1 + 4] = params_np["b1"][0]
    slab[0:H, c1 + 5] = params_np["w2"][:, 0]
    slab[0, c1 + 6] = params_np["b2"][0, 0]

    # dense adjacency + its transpose (duplicate edges accumulate, matching
    # the reference index_add_)
    for (i, p) in edges:
        slab[r_adj + p, i] += 1.0
        slab[r_adjt + i, p] += 1.0

    # fused candidate-pair one-hot selector, lane-padded to p_pad
    for c, (i, j) in enumerate(candidate_pairs):
        slab[r_sel + i, c] = 1.0
        slab[r_sel + j, p_pad + c] = 1.0

    return slab, (r_adj, r_adjt, r_sel)


@functools.partial(jax.jit, static_argnames=(
    "n", "m", "fi", "fp", "hidden", "p_pad", "num_pairs", "rounds",
    "r_adj", "r_adjt", "r_sel"))
def _device_forward(const_slab, item_feat, pattern_feat, *, n, m, fi, fp,
                    hidden, p_pad, num_pairs, rounds, r_adj, r_adjt, r_sel):
    # tiny runtime-data slab (the only device-side glue; fused under this jit)
    feat_rows = _round_up(fi + fp, 8)
    feat_cols = max(128, _round_up(max(n, m), 128))
    feat_slab = (jnp.zeros((feat_rows, feat_cols), jnp.float32)
                 .at[0:fi, 0:n].set(item_feat.T.astype(jnp.float32))
                 .at[fi:fi + fp, 0:m].set(pattern_feat.T.astype(jnp.float32)))

    kernel = functools.partial(
        _gnn_pair_kernel, hidden=hidden, fi=fi, fp=fp, n=n, m=m, p_pad=p_pad,
        r_adj=r_adj, r_adjt=r_adjt, r_sel=r_sel, rounds=rounds)

    flops = (2 * hidden * (fi * n + fp * m)
             + rounds * (4 * hidden * n * m + 2 * hidden * hidden * (n + m))
             + 4 * hidden * n * p_pad
             + 4 * hidden * hidden * p_pad
             + 2 * hidden * p_pad)
    bytes_accessed = 4 * (const_slab.size + feat_rows * feat_cols + 8 * p_pad)

    vmem_spec = pl.BlockSpec(memory_space=pltpu.MemorySpace.VMEM)
    out = pl.pallas_call(
        kernel,
        out_shape=jax.ShapeDtypeStruct((8, p_pad), jnp.float32),
        in_specs=[vmem_spec, vmem_spec],
        out_specs=vmem_spec,
        compiler_params=pltpu.CompilerParams(vmem_limit_bytes=2 * 1024 * 1024),
        cost_estimate=pl.CostEstimate(flops=int(flops), transcendentals=0,
                                      bytes_accessed=int(bytes_accessed)),
    )(const_slab, feat_slab)
    return out[0, :num_pairs]   # strip sublane/lane padding -> [num_pairs]


def item_pair_branch_forward(params, item_feat, pattern_feat, edges, candidate_pairs):
    n = int(item_feat.shape[0])
    m = int(pattern_feat.shape[0])
    num_pairs = len(candidate_pairs)
    H, Fi, Fp = HIDDEN_DIM, ITEM_FEAT_DIM, PATTERN_FEAT_DIM
    # pair count padded to a multiple of 128 so lane slices and the output
    # tile are lane-dense
    p_pad = max(128, _round_up(num_pairs, 128))
    rounds = MP_ROUNDS if len(edges) > 0 else 0

    # host-side (numpy) glue: no scatter/concat ops on the device timeline
    params_np = {k: np.asarray(v) for k, v in params.items()}
    const_slab, (r_adj, r_adjt, r_sel) = _build_const_slab(
        params_np, edges, candidate_pairs, n, m, H, Fi, Fp, p_pad)

    return _device_forward(
        jnp.asarray(const_slab), item_feat, pattern_feat,
        n=n, m=m, fi=Fi, fp=Fp, hidden=H, p_pad=p_pad, num_pairs=num_pairs,
        rounds=rounds, r_adj=r_adj, r_adjt=r_adjt, r_sel=r_sel)


def _reference_forward(params, item_feat, pattern_feat, edges, candidate_pairs):
    """Plain-JAX mirror of the PyTorch forward, for correctness checking."""
    relu = jax.nn.relu
    i_idx = jnp.asarray([e[0] for e in edges], jnp.int32)
    p_idx = jnp.asarray([e[1] for e in edges], jnp.int32)
    n, m = item_feat.shape[0], pattern_feat.shape[0]
    h_item = relu(item_feat @ params["w_ie"] + params["b_ie"])
    h_pat = relu(pattern_feat @ params["w_pe"] + params["b_pe"])
    for _ in range(MP_ROUNDS):
        p_msg = jnp.zeros((m, HIDDEN_DIM)).at[p_idx].add(h_item[i_idx])
        p_msg = relu(p_msg @ params["w_i2p"] + params["b_i2p"])
        h_pat = relu(h_pat + p_msg)
        i_msg = jnp.zeros((n, HIDDEN_DIM)).at[i_idx].add(h_pat[p_idx])
        i_msg = relu(i_msg @ params["w_p2i"] + params["b_p2i"])
        h_item = relu(h_item + i_msg)
    out = []
    for i, j in candidate_pairs:
        z = relu(h_item[i] @ params["w1a"] + h_item[j] @ params["w1b"] + params["b1"][0])
        out.append(z @ params["w2"][:, 0] + params["b2"][0, 0])
    return jnp.stack(out)


if __name__ == "__main__":
    key = jax.random.PRNGKey(0)
    k_param, k_item, k_pat = jax.random.split(key, 3)

    n_items, n_patterns = 8, 6
    item_feat = jax.random.normal(k_item, (n_items, ITEM_FEAT_DIM), jnp.float32)
    pattern_feat = jax.random.normal(k_pat, (n_patterns, PATTERN_FEAT_DIM), jnp.float32)
    edges = [(0, 0), (1, 0), (2, 1), (3, 2), (4, 3), (5, 3), (6, 4), (7, 5), (0, 5)]
    candidate_pairs = [(0, 1), (2, 3), (4, 7), (1, 6), (5, 0)]

    params = init_params(k_param)

    scores = item_pair_branch_forward(params, item_feat, pattern_feat,
                                      edges, candidate_pairs)
    scores = jax.block_until_ready(scores)

    ref = _reference_forward(params, item_feat, pattern_feat, edges, candidate_pairs)
    assert scores.shape == (len(candidate_pairs),)
    assert jnp.allclose(scores, ref, atol=1e-4, rtol=1e-4), (scores, ref)

    print("KERNEL_OK")
</pallas_src>

<mosaic_0001>
module attributes {stable_mosaic.version = 11 : i64} {
  func.func @_gnn_pair_kernel(%arg0: memref<56x256xf32, #tpu.memory_space<vmem>>, %arg1: memref<8x128xf32, #tpu.memory_space<vmem>>, %arg2: memref<8x128xf32, #tpu.memory_space<vmem>>) attributes {dimension_semantics = [], scalar_prefetch = 0 : i64, scratch_operands = 0 : i64, tpu.core_type = #tpu.core_type<tc>} {
    %c0 = arith.constant 0 : index
    %c0_0 = arith.constant 0 : index
    %0 = vector.load %arg0[%c0, %c0_0] : memref<56x256xf32, #tpu.memory_space<vmem>>, vector<32x64xf32>
    %c0_1 = arith.constant 0 : index
    %c64 = arith.constant 64 : index
    %1 = vector.load %arg0[%c0_1, %c64] : memref<56x256xf32, #tpu.memory_space<vmem>>, vector<32x32xf32>
    %c0_2 = arith.constant 0 : index
    %c96 = arith.constant 96 : index
    %2 = vector.load %arg0[%c0_2, %c96] : memref<56x256xf32, #tpu.memory_space<vmem>>, vector<32x32xf32>
    %c0_3 = arith.constant 0 : index
    %c128 = arith.constant 128 : index
    %3 = vector.load %arg0[%c0_3, %c128] : memref<56x256xf32, #tpu.memory_space<vmem>>, vector<32x2xf32>
    %c0_4 = arith.constant 0 : index
    %c130 = arith.constant 130 : index
    %4 = vector.load %arg0[%c0_4, %c130] : memref<56x256xf32, #tpu.memory_space<vmem>>, vector<32x3xf32>
    %c0_5 = arith.constant 0 : index
    %c133 = arith.constant 133 : index
    %5 = vector.load %arg0[%c0_5, %c133] : memref<56x256xf32, #tpu.memory_space<vmem>>, vector<32x1xf32>
    %c0_6 = arith.constant 0 : index
    %c134 = arith.constant 134 : index
    %6 = vector.load %arg0[%c0_6, %c134] : memref<56x256xf32, #tpu.memory_space<vmem>>, vector<32x1xf32>
    %c0_7 = arith.constant 0 : index
    %c135 = arith.constant 135 : index
    %7 = vector.load %arg0[%c0_7, %c135] : memref<56x256xf32, #tpu.memory_space<vmem>>, vector<32x1xf32>
    %c0_8 = arith.constant 0 : index
    %c136 = arith.constant 136 : index
    %8 = vector.load %arg0[%c0_8, %c136] : memref<56x256xf32, #tpu.memory_space<vmem>>, vector<32x1xf32>
    %c0_9 = arith.constant 0 : index
    %c137 = arith.constant 137 : index
    %9 = vector.load %arg0[%c0_9, %c137] : memref<56x256xf32, #tpu.memory_space<vmem>>, vector<32x1xf32>
    %c0_10 = arith.constant 0 : index
    %c138 = arith.constant 138 : index
    %10 = vector.load %arg0[%c0_10, %c138] : memref<56x256xf32, #tpu.memory_space<vmem>>, vector<32x1xf32>
    %c0_11 = arith.constant 0 : index
    %c139 = arith.constant 139 : index
    %11 = vector.load %arg0[%c0_11, %c139] : memref<56x256xf32, #tpu.memory_space<vmem>>, vector<1x1xf32>
    %c32 = arith.constant 32 : index
    %c0_12 = arith.constant 0 : index
    %12 = vector.load %arg0[%c32, %c0_12] : memref<56x256xf32, #tpu.memory_space<vmem>>, vector<6x8xf32>
    %c40 = arith.constant 40 : index
    %c0_13 = arith.constant 0 : index
    %13 = vector.load %arg0[%c40, %c0_13] : memref<56x256xf32, #tpu.memory_space<vmem>>, vector<8x6xf32>
    %c48 = arith.constant 48 : index
    %c0_14 = arith.constant 0 : index
    %14 = vector.load %arg0[%c48, %c0_14] : memref<56x256xf32, #tpu.memory_space<vmem>>, vector<8x256xf32>
    %c0_15 = arith.constant 0 : index
    %c0_16 = arith.constant 0 : index
    %15 = vector.load %arg1[%c0_15, %c0_16] : memref<8x128xf32, #tpu.memory_space<vmem>>, vector<2x8xf32>
    %c2 = arith.constant 2 : index
    %c0_17 = arith.constant 0 : index
    %16 = vector.load %arg1[%c2, %c0_17] : memref<8x128xf32, #tpu.memory_space<vmem>>, vector<3x6xf32>
    %17 = vector.extract_strided_slice %3 {offsets = [0, 0], sizes = [32, 1], strides = [1, 1]} : vector<32x2xf32> to vector<32x1xf32>
    %18 = vector.extract_strided_slice %15 {offsets = [0, 0], sizes = [1, 8], strides = [1, 1]} : vector<2x8xf32> to vector<1x8xf32>
    %19 = vector.broadcast %17 : vector<32x1xf32> to vector<32x8xf32>
    %20 = vector.broadcast %18 : vector<1x8xf32> to vector<32x8xf32>
    %21 = arith.mulf %19, %20 : vector<32x8xf32>
    %22 = vector.extract_strided_slice %3 {offsets = [0, 1], sizes = [32, 1], strides = [1, 1]} : vector<32x2xf32> to vector<32x1xf32>
    %23 = vector.extract_strided_slice %15 {offsets = [1, 0], sizes = [1, 8], strides = [1, 1]} : vector<2x8xf32> to vector<1x8xf32>
    %24 = vector.broadcast %22 : vector<32x1xf32> to vector<32x8xf32>
    %25 = vector.broadcast %23 : vector<1x8xf32> to vector<32x8xf32>
    %26 = arith.mulf %24, %25 : vector<32x8xf32>
    %27 = arith.addf %21, %26 : vector<32x8xf32>
    %28 = vector.broadcast %5 : vector<32x1xf32> to vector<32x8xf32>
    %29 = arith.addf %27, %28 : vector<32x8xf32>
    %cst = arith.constant 0.000000e+00 : f32
    %30 = vector.broadcast %cst : f32 to vector<32x8xf32>
    %31 = arith.maximumf %29, %30 : vector<32x8xf32>
    %32 = vector.extract_strided_slice %4 {offsets = [0, 0], sizes = [32, 1], strides = [1, 1]} : vector<32x3xf32> to vector<32x1xf32>
    %33 = vector.extract_strided_slice %16 {offsets = [0, 0], sizes = [1, 6], strides = [1, 1]} : vector<3x6xf32> to vector<1x6xf32>
    %34 = vector.broadcast %32 : vector<32x1xf32> to vector<32x6xf32>
    %35 = vector.broadcast %33 : vector<1x6xf32> to vector<32x6xf32>
    %36 = arith.mulf %34, %35 : vector<32x6xf32>
    %37 = vector.extract_strided_slice %4 {offsets = [0, 1], sizes = [32, 1], strides = [1, 1]} : vector<32x3xf32> to vector<32x1xf32>
    %38 = vector.extract_strided_slice %16 {offsets = [1, 0], sizes = [1, 6], strides = [1, 1]} : vector<3x6xf32> to vector<1x6xf32>
    %39 = vector.broadcast %37 : vector<32x1xf32> to vector<32x6xf32>
    %40 = vector.broadcast %38 : vector<1x6xf32> to vector<32x6xf32>
    %41 = arith.mulf %39, %40 : vector<32x6xf32>
    %42 = arith.addf %36, %41 : vector<32x6xf32>
    %43 = vector.extract_strided_slice %4 {offsets = [0, 2], sizes = [32, 1], strides = [1, 1]} : vector<32x3xf32> to vector<32x1xf32>
    %44 = vector.extract_strided_slice %16 {offsets = [2, 0], sizes = [1, 6], strides = [1, 1]} : vector<3x6xf32> to vector<1x6xf32>
    %45 = vector.broadcast %43 : vector<32x1xf32> to vector<32x6xf32>
    %46 = vector.broadcast %44 : vector<1x6xf32> to vector<32x6xf32>
    %47 = arith.mulf %45, %46 : vector<32x6xf32>
    %48 = arith.addf %42, %47 : vector<32x6xf32>
    %49 = vector.broadcast %6 : vector<32x1xf32> to vector<32x6xf32>
    %50 = arith.addf %48, %49 : vector<32x6xf32>
    %cst_18 = arith.constant 0.000000e+00 : f32
    %51 = vector.broadcast %cst_18 : f32 to vector<32x6xf32>
    %52 = arith.maximumf %50, %51 : vector<32x6xf32>
    %53 = vector.extract_strided_slice %31 {offsets = [0, 0], sizes = [32, 1], strides = [1, 1]} : vector<32x8xf32> to vector<32x1xf32>
    %54 = vector.extract_strided_slice %13 {offsets = [0, 0], sizes = [1, 6], strides = [1, 1]} : vector<8x6xf32> to vector<1x6xf32>
    %55 = vector.broadcast %53 : vector<32x1xf32> to vector<32x6xf32>
    %56 = vector.broadcast %54 : vector<1x6xf32> to vector<32x6xf32>
    %57 = arith.mulf %55, %56 : vector<32x6xf32>
    %58 = vector.extract_strided_slice %31 {offsets = [0, 1], sizes = [32, 1], strides = [1, 1]} : vector<32x8xf32> to vector<32x1xf32>
    %59 = vector.extract_strided_slice %13 {offsets = [1, 0], sizes = [1, 6], strides = [1, 1]} : vector<8x6xf32> to vector<1x6xf32>
    %60 = vector.broadcast %58 : vector<32x1xf32> to vector<32x6xf32>
    %61 = vector.broadcast %59 : vector<1x6xf32> to vector<32x6xf32>
    %62 = arith.mulf %60, %61 : vector<32x6xf32>
    %63 = arith.addf %57, %62 : vector<32x6xf32>
    %64 = vector.extract_strided_slice %31 {offsets = [0, 2], sizes = [32, 1], strides = [1, 1]} : vector<32x8xf32> to vector<32x1xf32>
    %65 = vector.extract_strided_slice %13 {offsets = [2, 0], sizes = [1, 6], strides = [1, 1]} : vector<8x6xf32> to vector<1x6xf32>
    %66 = vector.broadcast %64 : vector<32x1xf32> to vector<32x6xf32>
    %67 = vector.broadcast %65 : vector<1x6xf32> to vector<32x6xf32>
    %68 = arith.mulf %66, %67 : vector<32x6xf32>
    %69 = arith.addf %63, %68 : vector<32x6xf32>
    %70 = vector.extract_strided_slice %31 {offsets = [0, 3], sizes = [32, 1], strides = [1, 1]} : vector<32x8xf32> to vector<32x1xf32>
    %71 = vector.extract_strided_slice %13 {offsets = [3, 0], sizes = [1, 6], strides = [1, 1]} : vector<8x6xf32> to vector<1x6xf32>
    %72 = vector.broadcast %70 : vector<32x1xf32> to vector<32x6xf32>
    %73 = vector.broadcast %71 : vector<1x6xf32> to vector<32x6xf32>
    %74 = arith.mulf %72, %73 : vector<32x6xf32>
    %75 = arith.addf %69, %74 : vector<32x6xf32>
    %76 = vector.extract_strided_slice %31 {offsets = [0, 4], sizes = [32, 1], strides = [1, 1]} : vector<32x8xf32> to vector<32x1xf32>
    %77 = vector.extract_strided_slice %13 {offsets = [4, 0], sizes = [1, 6], strides = [1, 1]} : vector<8x6xf32> to vector<1x6xf32>
    %78 = vector.broadcast %76 : vector<32x1xf32> to vector<32x6xf32>
    %79 = vector.broadcast %77 : vector<1x6xf32> to vector<32x6xf32>
    %80 = arith.mulf %78, %79 : vector<32x6xf32>
    %81 = arith.addf %75, %80 : vector<32x6xf32>
    %82 = vector.extract_strided_slice %31 {offsets = [0, 5], sizes = [32, 1], strides = [1, 1]} : vector<32x8xf32> to vector<32x1xf32>
    %83 = vector.extract_strided_slice %13 {offsets = [5, 0], sizes = [1, 6], strides = [1, 1]} : vector<8x6xf32> to vector<1x6xf32>
    %84 = vector.broadcast %82 : vector<32x1xf32> to vector<32x6xf32>
    %85 = vector.broadcast %83 : vector<1x6xf32> to vector<32x6xf32>
    %86 = arith.mulf %84, %85 : vector<32x6xf32>
    %87 = arith.addf %81, %86 : vector<32x6xf32>
    %88 = vector.extract_strided_slice %31 {offsets = [0, 6], sizes = [32, 1], strides = [1, 1]} : vector<32x8xf32> to vector<32x1xf32>
    %89 = vector.extract_strided_slice %13 {offsets = [6, 0], sizes = [1, 6], strides = [1, 1]} : vector<8x6xf32> to vector<1x6xf32>
    %90 = vector.broadcast %88 : vector<32x1xf32> to vector<32x6xf32>
    %91 = vector.broadcast %89 : vector<1x6xf32> to vector<32x6xf32>
    %92 = arith.mulf %90, %91 : vector<32x6xf32>
    %93 = arith.addf %87, %92 : vector<32x6xf32>
    %94 = vector.extract_strided_slice %31 {offsets = [0, 7], sizes = [32, 1], strides = [1, 1]} : vector<32x8xf32> to vector<32x1xf32>
    %95 = vector.extract_strided_slice %13 {offsets = [7, 0], sizes = [1, 6], strides = [1, 1]} : vector<8x6xf32> to vector<1x6xf32>
    %96 = vector.broadcast %94 : vector<32x1xf32> to vector<32x6xf32>
    %97 = vector.broadcast %95 : vector<1x6xf32> to vector<32x6xf32>
    %98 = arith.mulf %96, %97 : vector<32x6xf32>
    %99 = arith.addf %93, %98 : vector<32x6xf32>
    %cst_19 = arith.constant dense<0.000000e+00> : vector<32x6xf32>
    %100 = tpu.matmul %1, %99, %cst_19 {dimension_numbers = #tpu.dot_dimension_numbers<[1], [0], [0], [1], [0, 0, 1, 1], [], []>} : vector<32x32xf32>, vector<32x6xf32>, vector<32x6xf32> -> vector<32x6xf32>
    %101 = vector.broadcast %7 : vector<32x1xf32> to vector<32x6xf32>
    %102 = arith.addf %100, %101 : vector<32x6xf32>
    %cst_20 = arith.constant 0.000000e+00 : f32
    %103 = vector.broadcast %cst_20 : f32 to vector<32x6xf32>
    %104 = arith.maximumf %102, %103 : vector<32x6xf32>
    %105 = arith.addf %52, %104 : vector<32x6xf32>
    %cst_21 = arith.constant 0.000000e+00 : f32
    %106 = vector.broadcast %cst_21 : f32 to vector<32x6xf32>
    %107 = arith.maximumf %105, %106 : vector<32x6xf32>
    %108 = vector.extract_strided_slice %107 {offsets = [0, 0], sizes = [32, 1], strides = [1, 1]} : vector<32x6xf32> to vector<32x1xf32>
    %109 = vector.extract_strided_slice %12 {offsets = [0, 0], sizes = [1, 8], strides = [1, 1]} : vector<6x8xf32> to vector<1x8xf32>
    %110 = vector.broadcast %108 : vector<32x1xf32> to vector<32x8xf32>
    %111 = vector.broadcast %109 : vector<1x8xf32> to vector<32x8xf32>
    %112 = arith.mulf %110, %111 : vector<32x8xf32>
    %113 = vector.extract_strided_slice %107 {offsets = [0, 1], sizes = [32, 1], strides = [1, 1]} : vector<32x6xf32> to vector<32x1xf32>
    %114 = vector.extract_strided_slice %12 {offsets = [1, 0], sizes = [1, 8], strides = [1, 1]} : vector<6x8xf32> to vector<1x8xf32>
    %115 = vector.broadcast %113 : vector<32x1xf32> to vector<32x8xf32>
    %116 = vector.broadcast %114 : vector<1x8xf32> to vector<32x8xf32>
    %117 = arith.mulf %115, %116 : vector<32x8xf32>
    %118 = arith.addf %112, %117 : vector<32x8xf32>
    %119 = vector.extract_strided_slice %107 {offsets = [0, 2], sizes = [32, 1], strides = [1, 1]} : vector<32x6xf32> to vector<32x1xf32>
    %120 = vector.extract_strided_slice %12 {offsets = [2, 0], sizes = [1, 8], strides = [1, 1]} : vector<6x8xf32> to vector<1x8xf32>
    %121 = vector.broadcast %119 : vector<32x1xf32> to vector<32x8xf32>
    %122 = vector.broadcast %120 : vector<1x8xf32> to vector<32x8xf32>
    %123 = arith.mulf %121, %122 : vector<32x8xf32>
    %124 = arith.addf %118, %123 : vector<32x8xf32>
    %125 = vector.extract_strided_slice %107 {offsets = [0, 3], sizes = [32, 1], strides = [1, 1]} : vector<32x6xf32> to vector<32x1xf32>
    %126 = vector.extract_strided_slice %12 {offsets = [3, 0], sizes = [1, 8], strides = [1, 1]} : vector<6x8xf32> to vector<1x8xf32>
    %127 = vector.broadcast %125 : vector<32x1xf32> to vector<32x8xf32>
    %128 = vector.broadcast %126 : vector<1x8xf32> to vector<32x8xf32>
    %129 = arith.mulf %127, %128 : vector<32x8xf32>
    %130 = arith.addf %124, %129 : vector<32x8xf32>
    %131 = vector.extract_strided_slice %107 {offsets = [0, 4], sizes = [32, 1], strides = [1, 1]} : vector<32x6xf32> to vector<32x1xf32>
    %132 = vector.extract_strided_slice %12 {offsets = [4, 0], sizes = [1, 8], strides = [1, 1]} : vector<6x8xf32> to vector<1x8xf32>
    %133 = vector.broadcast %131 : vector<32x1xf32> to vector<32x8xf32>
    %134 = vector.broadcast %132 : vector<1x8xf32> to vector<32x8xf32>
    %135 = arith.mulf %133, %134 : vector<32x8xf32>
    %136 = arith.addf %130, %135 : vector<32x8xf32>
    %137 = vector.extract_strided_slice %107 {offsets = [0, 5], sizes = [32, 1], strides = [1, 1]} : vector<32x6xf32> to vector<32x1xf32>
    %138 = vector.extract_strided_slice %12 {offsets = [5, 0], sizes = [1, 8], strides = [1, 1]} : vector<6x8xf32> to vector<1x8xf32>
    %139 = vector.broadcast %137 : vector<32x1xf32> to vector<32x8xf32>
    %140 = vector.broadcast %138 : vector<1x8xf32> to vector<32x8xf32>
    %141 = arith.mulf %139, %140 : vector<32x8xf32>
    %142 = arith.addf %136, %141 : vector<32x8xf32>
    %cst_22 = arith.constant dense<0.000000e+00> : vector<32x8xf32>
    %143 = tpu.matmul %2, %142, %cst_22 {dimension_numbers = #tpu.dot_dimension_numbers<[1], [0], [0], [1], [0, 0, 1, 1], [], []>} : vector<32x32xf32>, vector<32x8xf32>, vector<32x8xf32> -> vector<32x8xf32>
    %144 = vector.broadcast %8 : vector<32x1xf32> to vector<32x8xf32>
    %145 = arith.addf %143, %144 : vector<32x8xf32>
    %cst_23 = arith.constant 0.000000e+00 : f32
    %146 = vector.broadcast %cst_23 : f32 to vector<32x8xf32>
    %147 = arith.maximumf %145, %146 : vector<32x8xf32>
    %148 = arith.addf %31, %147 : vector<32x8xf32>
    %cst_24 = arith.constant 0.000000e+00 : f32
    %149 = vector.broadcast %cst_24 : f32 to vector<32x8xf32>
    %150 = arith.maximumf %148, %149 : vector<32x8xf32>
    %151 = vector.extract_strided_slice %150 {offsets = [0, 0], sizes = [32, 1], strides = [1, 1]} : vector<32x8xf32> to vector<32x1xf32>
    %152 = vector.extract_strided_slice %13 {offsets = [0, 0], sizes = [1, 6], strides = [1, 1]} : vector<8x6xf32> to vector<1x6xf32>
    %153 = vector.broadcast %151 : vector<32x1xf32> to vector<32x6xf32>
    %154 = vector.broadcast %152 : vector<1x6xf32> to vector<32x6xf32>
    %155 = arith.mulf %153, %154 : vector<32x6xf32>
    %156 = vector.extract_strided_slice %150 {offsets = [0, 1], sizes = [32, 1], strides = [1, 1]} : vector<32x8xf32> to vector<32x1xf32>
    %157 = vector.extract_strided_slice %13 {offsets = [1, 0], sizes = [1, 6], strides = [1, 1]} : vector<8x6xf32> to vector<1x6xf32>
    %158 = vector.broadcast %156 : vector<32x1xf32> to vector<32x6xf32>
    %159 = vector.broadcast %157 : vector<1x6xf32> to vector<32x6xf32>
    %160 = arith.mulf %158, %159 : vector<32x6xf32>
    %161 = arith.addf %155, %160 : vector<32x6xf32>
    %162 = vector.extract_strided_slice %150 {offsets = [0, 2], sizes = [32, 1], strides = [1, 1]} : vector<32x8xf32> to vector<32x1xf32>
    %163 = vector.extract_strided_slice %13 {offsets = [2, 0], sizes = [1, 6], strides = [1, 1]} : vector<8x6xf32> to vector<1x6xf32>
    %164 = vector.broadcast %162 : vector<32x1xf32> to vector<32x6xf32>
    %165 = vector.broadcast %163 : vector<1x6xf32> to vector<32x6xf32>
    %166 = arith.mulf %164, %165 : vector<32x6xf32>
    %167 = arith.addf %161, %166 : vector<32x6xf32>
    %168 = vector.extract_strided_slice %150 {offsets = [0, 3], sizes = [32, 1], strides = [1, 1]} : vector<32x8xf32> to vector<32x1xf32>
    %169 = vector.extract_strided_slice %13 {offsets = [3, 0], sizes = [1, 6], strides = [1, 1]} : vector<8x6xf32> to vector<1x6xf32>
    %170 = vector.broadcast %168 : vector<32x1xf32> to vector<32x6xf32>
    %171 = vector.broadcast %169 : vector<1x6xf32> to vector<32x6xf32>
    %172 = arith.mulf %170, %171 : vector<32x6xf32>
    %173 = arith.addf %167, %172 : vector<32x6xf32>
    %174 = vector.extract_strided_slice %150 {offsets = [0, 4], sizes = [32, 1], strides = [1, 1]} : vector<32x8xf32> to vector<32x1xf32>
    %175 = vector.extract_strided_slice %13 {offsets = [4, 0], sizes = [1, 6], strides = [1, 1]} : vector<8x6xf32> to vector<1x6xf32>
    %176 = vector.broadcast %174 : vector<32x1xf32> to vector<32x6xf32>
    %177 = vector.broadcast %175 : vector<1x6xf32> to vector<32x6xf32>
    %178 = arith.mulf %176, %177 : vector<32x6xf32>
    %179 = arith.addf %173, %178 : vector<32x6xf32>
    %180 = vector.extract_strided_slice %150 {offsets = [0, 5], sizes = [32, 1], strides = [1, 1]} : vector<32x8xf32> to vector<32x1xf32>
    %181 = vector.extract_strided_slice %13 {offsets = [5, 0], sizes = [1, 6], strides = [1, 1]} : vector<8x6xf32> to vector<1x6xf32>
    %182 = vector.broadcast %180 : vector<32x1xf32> to vector<32x6xf32>
    %183 = vector.broadcast %181 : vector<1x6xf32> to vector<32x6xf32>
    %184 = arith.mulf %182, %183 : vector<32x6xf32>
    %185 = arith.addf %179, %184 : vector<32x6xf32>
    %186 = vector.extract_strided_slice %150 {offsets = [0, 6], sizes = [32, 1], strides = [1, 1]} : vector<32x8xf32> to vector<32x1xf32>
    %187 = vector.extract_strided_slice %13 {offsets = [6, 0], sizes = [1, 6], strides = [1, 1]} : vector<8x6xf32> to vector<1x6xf32>
    %188 = vector.broadcast %186 : vector<32x1xf32> to vector<32x6xf32>
    %189 = vector.broadcast %187 : vector<1x6xf32> to vector<32x6xf32>
    %190 = arith.mulf %188, %189 : vector<32x6xf32>
    %191 = arith.addf %185, %190 : vector<32x6xf32>
    %192 = vector.extract_strided_slice %150 {offsets = [0, 7], sizes = [32, 1], strides = [1, 1]} : vector<32x8xf32> to vector<32x1xf32>
    %193 = vector.extract_strided_slice %13 {offsets = [7, 0], sizes = [1, 6], strides = [1, 1]} : vector<8x6xf32> to vector<1x6xf32>
    %194 = vector.broadcast %192 : vector<32x1xf32> to vector<32x6xf32>
    %195 = vector.broadcast %193 : vector<1x6xf32> to vector<32x6xf32>
    %196 = arith.mulf %194, %195 : vector<32x6xf32>
    %197 = arith.addf %191, %196 : vector<32x6xf32>
    %cst_25 = arith.constant dense<0.000000e+00> : vector<32x6xf32>
    %198 = tpu.matmul %1, %197, %cst_25 {dimension_numbers = #tpu.dot_dimension_numbers<[1], [0], [0], [1], [0, 0, 1, 1], [], []>} : vector<32x32xf32>, vector<32x6xf32>, vector<32x6xf32> -> vector<32x6xf32>
    %199 = vector.broadcast %7 : vector<32x1xf32> to vector<32x6xf32>
    %200 = arith.addf %198, %199 : vector<32x6xf32>
    %cst_26 = arith.constant 0.000000e+00 : f32
    %201 = vector.broadcast %cst_26 : f32 to vector<32x6xf32>
    %202 = arith.maximumf %200, %201 : vector<32x6xf32>
    %203 = arith.addf %107, %202 : vector<32x6xf32>
    %cst_27 = arith.constant 0.000000e+00 : f32
    %204 = vector.broadcast %cst_27 : f32 to vector<32x6xf32>
    %205 = arith.maximumf %203, %204 : vector<32x6xf32>
    %206 = vector.extract_strided_slice %205 {offsets = [0, 0], sizes = [32, 1], strides = [1, 1]} : vector<32x6xf32> to vector<32x1xf32>
    %207 = vector.extract_strided_slice %12 {offsets = [0, 0], sizes = [1, 8], strides = [1, 1]} : vector<6x8xf32> to vector<1x8xf32>
    %208 = vector.broadcast %206 : vector<32x1xf32> to vector<32x8xf32>
    %209 = vector.broadcast %207 : vector<1x8xf32> to vector<32x8xf32>
    %210 = arith.mulf %208, %209 : vector<32x8xf32>
    %211 = vector.extract_strided_slice %205 {offsets = [0, 1], sizes = [32, 1], strides = [1, 1]} : vector<32x6xf32> to vector<32x1xf32>
    %212 = vector.extract_strided_slice %12 {offsets = [1, 0], sizes = [1, 8], strides = [1, 1]} : vector<6x8xf32> to vector<1x8xf32>
    %213 = vector.broadcast %211 : vector<32x1xf32> to vector<32x8xf32>
    %214 = vector.broadcast %212 : vector<1x8xf32> to vector<32x8xf32>
    %215 = arith.mulf %213, %214 : vector<32x8xf32>
    %216 = arith.addf %210, %215 : vector<32x8xf32>
    %217 = vector.extract_strided_slice %205 {offsets = [0, 2], sizes = [32, 1], strides = [1, 1]} : vector<32x6xf32> to vector<32x1xf32>
    %218 = vector.extract_strided_slice %12 {offsets = [2, 0], sizes = [1, 8], strides = [1, 1]} : vector<6x8xf32> to vector<1x8xf32>
    %219 = vector.broadcast %217 : vector<32x1xf32> to vector<32x8xf32>
    %220 = vector.broadcast %218 : vector<1x8xf32> to vector<32x8xf32>
    %221 = arith.mulf %219, %220 : vector<32x8xf32>
    %222 = arith.addf %216, %221 : vector<32x8xf32>
    %223 = vector.extract_strided_slice %205 {offsets = [0, 3], sizes = [32, 1], strides = [1, 1]} : vector<32x6xf32> to vector<32x1xf32>
    %224 = vector.extract_strided_slice %12 {offsets = [3, 0], sizes = [1, 8], strides = [1, 1]} : vector<6x8xf32> to vector<1x8xf32>
    %225 = vector.broadcast %223 : vector<32x1xf32> to vector<32x8xf32>
    %226 = vector.broadcast %224 : vector<1x8xf32> to vector<32x8xf32>
    %227 = arith.mulf %225, %226 : vector<32x8xf32>
    %228 = arith.addf %222, %227 : vector<32x8xf32>
    %229 = vector.extract_strided_slice %205 {offsets = [0, 4], sizes = [32, 1], strides = [1, 1]} : vector<32x6xf32> to vector<32x1xf32>
    %230 = vector.extract_strided_slice %12 {offsets = [4, 0], sizes = [1, 8], strides = [1, 1]} : vector<6x8xf32> to vector<1x8xf32>
    %231 = vector.broadcast %229 : vector<32x1xf32> to vector<32x8xf32>
    %232 = vector.broadcast %230 : vector<1x8xf32> to vector<32x8xf32>
    %233 = arith.mulf %231, %232 : vector<32x8xf32>
    %234 = arith.addf %228, %233 : vector<32x8xf32>
    %235 = vector.extract_strided_slice %205 {offsets = [0, 5], sizes = [32, 1], strides = [1, 1]} : vector<32x6xf32> to vector<32x1xf32>
    %236 = vector.extract_strided_slice %12 {offsets = [5, 0], sizes = [1, 8], strides = [1, 1]} : vector<6x8xf32> to vector<1x8xf32>
    %237 = vector.broadcast %235 : vector<32x1xf32> to vector<32x8xf32>
    %238 = vector.broadcast %236 : vector<1x8xf32> to vector<32x8xf32>
    %239 = arith.mulf %237, %238 : vector<32x8xf32>
    %240 = arith.addf %234, %239 : vector<32x8xf32>
    %cst_28 = arith.constant dense<0.000000e+00> : vector<32x8xf32>
    %241 = tpu.matmul %2, %240, %cst_28 {dimension_numbers = #tpu.dot_dimension_numbers<[1], [0], [0], [1], [0, 0, 1, 1], [], []>} : vector<32x32xf32>, vector<32x8xf32>, vector<32x8xf32> -> vector<32x8xf32>
    %242 = vector.broadcast %8 : vector<32x1xf32> to vector<32x8xf32>
    %243 = arith.addf %241, %242 : vector<32x8xf32>
    %cst_29 = arith.constant 0.000000e+00 : f32
    %244 = vector.broadcast %cst_29 : f32 to vector<32x8xf32>
    %245 = arith.maximumf %243, %244 : vector<32x8xf32>
    %246 = arith.addf %150, %245 : vector<32x8xf32>
    %cst_30 = arith.constant 0.000000e+00 : f32
    %247 = vector.broadcast %cst_30 : f32 to vector<32x8xf32>
    %248 = arith.maximumf %246, %247 : vector<32x8xf32>
    %cst_31 = arith.constant dense<0.000000e+00> : vector<32x256xf32>
    %249 = tpu.matmul %248, %14, %cst_31 {dimension_numbers = #tpu.dot_dimension_numbers<[1], [0], [0], [1], [0, 0, 1, 1], [], []>} : vector<32x8xf32>, vector<8x256xf32>, vector<32x256xf32> -> vector<32x256xf32>
    %250 = vector.extract_strided_slice %249 {offsets = [0, 0], sizes = [32, 128], strides = [1, 1]} : vector<32x256xf32> to vector<32x128xf32>
    %251 = vector.extract_strided_slice %249 {offsets = [0, 128], sizes = [32, 128], strides = [1, 1]} : vector<32x256xf32> to vector<32x128xf32>
    %252 = tpu.concatenate %250, %251 in 0 : vector<32x128xf32>, vector<32x128xf32> -> vector<64x128xf32>
    %cst_32 = arith.constant dense<0.000000e+00> : vector<32x128xf32>
    %253 = tpu.matmul %0, %252, %cst_32 {dimension_numbers = #tpu.dot_dimension_numbers<[1], [0], [0], [1], [0, 0, 1, 1], [], []>} : vector<32x64xf32>, vector<64x128xf32>, vector<32x128xf32> -> vector<32x128xf32>
    %254 = vector.broadcast %9 : vector<32x1xf32> to vector<32x128xf32>
    %255 = arith.addf %253, %254 : vector<32x128xf32>
    %cst_33 = arith.constant 0.000000e+00 : f32
    %256 = vector.broadcast %cst_33 : f32 to vector<32x128xf32>
    %257 = arith.maximumf %255, %256 : vector<32x128xf32>
    %258 = vector.broadcast %10 : vector<32x1xf32> to vector<32x128xf32>
    %259 = arith.mulf %258, %257 : vector<32x128xf32>
    %cst_34 = arith.constant dense<0.000000e+00> : vector<128xf32>
    %260 = vector.multi_reduction <add>, %259, %cst_34 [0] : vector<32x128xf32> to vector<128xf32>
    %261 = vector.shape_cast %260 : vector<128xf32> to vector<1x128xf32>
    %262 = vector.broadcast %11 : vector<1x1xf32> to vector<1x128xf32>
    %263 = arith.addf %261, %262 : vector<1x128xf32>
    %264 = vector.shape_cast %263 : vector<1x128xf32> to vector<1x128xf32>
    %265 = vector.broadcast %264 : vector<1x128xf32> to vector<8x128xf32>
    %c0_35 = arith.constant 0 : index
    %c0_36 = arith.constant 0 : index
    %266 = vector.load %arg2[%c0_35, %c0_36] : memref<8x128xf32, #tpu.memory_space<vmem>>, vector<8x128xf32>
    tpu.vector_store %arg2[%c0_35, %c0_36], %265 {strides = array<i32>} : memref<8x128xf32, #tpu.memory_space<vmem>>, vector<8x128xf32>,
    return
  }
}

</mosaic_0001>

<bundles_post_ra>
// kernel: _device_forward.1
= control target key start
LH: loop header
LB: loop body
LE: loop exit
PB: predicated region body
PF: predicated region fallthrough
CT: control target
= control target key end

     0   :  { %7 = vsyncpa [#allocation3], 0  ;;  %s2043_s9 = smov [#allocation2]   ;;  %s2698_s0 = inlined_call_operand.hbm [shape: f32[56,256], index: 0, kind: input, shape index: {}]   ;;  %s2699_s1 = inlined_call_operand.vmem [shape: f32[8,128], index: 1, kind: input, shape index: {}]   ;;  %s2700_s2 = inlined_call_operand.vmem [shape: f32[8,128], index: 2, kind: output, shape index: {}]  }
   0x1   :  { %s13_s10 = sshll.u32 %s2043_s9, 4  ;;  %s2019_s13 = scalar_lea.hbm %s2698_s0, 1792  ;;  %s14_s10 = int_to_ptr.vmem [resolvable:$true] %s13_s10 }
   0x2   :  { %p2020_p0 = scmp.ne.s32.totalorder %s2698_s0, %s2019_s13  ;;  %p2023_p1 = scmp.lt.u32.totalorder %s2019_s13, %s2698_s0 }
   0x4   :  { %p2025_p2 = pnand %p2023_p1, %p2020_p0 }
   0x6   :  { %2028 = shalt.err (!%p2025_p2)
}
   0x7   :  { %s2029_s18 = scalar_lea.vmem %s14_s10, 1792  ;;  %p2034_p4 = scmp.lt.s32.totalorder %s14_s10, %s14_s10 }
   0x8   :  { %p2030_p3 = scmp.ne.s32.totalorder %s14_s10, %s2029_s18  ;;  %p2035_p5 = scmp.lt.s32.totalorder %s2029_s18, %s2029_s18 }
   0xa   :  { %p2036_p6 = por %p2035_p5, %p2034_p4 }
   0xc   :  { %p2037_p7 = pnand %p2036_p6, %p2030_p3 }
   0xe   :  { %2040 = shalt.err (!%p2037_p7)
}
   0xf   :  { %s2044_s19 = smov 256   ;;  %s2045_s20 = smov 16  }
  0x10   :  { %19 = dma.hbm_to_vmem [thread:$0]  %s2698_s0, 1792, %s14_s10, [#allocation3], %s2044_s19, %s2044_s19, %s2045_s20  }
  0x11   :  { %2041 = dma.done.wait [#allocation3], 1792  }
  0x12   :  { %2042 = vsyncadd [#allocation3], 4294965504  ;;  %v2705_v0 = vmov 1   ;;  %v2716_v1 = vmov 0   ;;  %v2090_v2 = vld [vmem:[#allocation2 + $0x8] sm:$0xff]  ;;  %v2094_v3 = vld [vmem:[#allocation2 + $0x18] sm:$0xff]  ;;  %v60_v7 = vlaneseq }
  0x13   :  { %1879 = vset.pattern.permute.xlu1 %v2705_v0  ;;  %1878 = vset.pattern.permute.xlu0 %v2716_v1  ;;  %v2098_v4 = vld [vmem:[#allocation2 + $0x28] sm:$0xff]  ;;  %v2100_v5 = vld [vmem:[#allocation2 + $0x38] sm:$0xff]  ;;  %v2708_v6 = vmov 5   ;;  %v38_v15 = vld [vmem:[%s2699_s1] sm:$0x3]  ;;  %v2714_v44 = vmov 2  }
  0x14   :  { %69 = vperm.xlu1 %1879, %v2090_v2   ;;  %42 = vperm.xlu0 %1878, %v2090_v2   ;;  %v2117_v10 = vshrl.u32 %v60_v7, 7  ;;  %v2718_v47 = vmov 4   ;;  %v2710_v48 = vmov 3   ;;  %v2701_v49 = vmov 7   ;;  %v2177_v50 = vld [vmem:[#allocation2] sm:$0xff]  ;;  %s2053_s24 = smov 64  }
  0x15   :  { %v2182_v51 = vld [vmem:[#allocation2 + $0x20] sm:$0xff]  ;;  %v2703_v52 = vmov 6   ;;  %v2214_v53 = vld [vmem:[#allocation2 + $0x10] sm:$0xff]  ;;  %vm476_vm0 = vcmask 261120   ;;  %vm1409_vm1 = vcmask 64512   ;;  %vm1527_vm2 = vcmask 523264  }
  0x16   :  { %v2120_v13 = vsub.s32 1, %v2117_v10  ;;  %v2123_v14 = vsub.s32 0, %v2117_v10  ;;  %v2218_v54 = vld [vmem:[#allocation2 + $0x30] sm:$0xff] }
  0x18   :  { %73 = vperm.xlu1 %1879, %v2094_v3   ;;  %47 = vperm.xlu0 %1878, %v2094_v3   ;;  %v87_v18 = vrot.slane %v38_v15, %v2120_v13  ;;  %v63_v19 = vrot.slane %v38_v15, %v2123_v14 }
  0x1c   :  { %1880 = vset.pattern.permute.xlu1 %v2716_v1  ;;  %52 = vperm.xlu0 %1878, %v2098_v4  }
  0x1d   :  { %57 = vperm.xlu1 %1880, %v2100_v5  }
  0x20   :  { %1881 = vset.pattern.permute.xlu0 %v2705_v0 }
  0x21   :  { %1882 = vset.pattern.permute.xlu1 %v2705_v0  ;;  %77 = vperm.xlu0 %1881, %v2098_v4  }
  0x22   :  { %81 = vperm.xlu1 %1882, %v2100_v5  }
  0x25   :  { %1884 = vset.pattern.permute.xlu0 %v2708_v6 }
  0x26   :  { %1883 = vset.pattern.permute.xlu1 %v2708_v6  ;;  %101 = vperm.xlu0 %1884, %v2094_v3  }
  0x27   :  { %97 = vperm.xlu1 %1883, %v2090_v2  }
  0x2a   :  { %1885 = vset.pattern.permute.xlu0 %v2716_v1 }
  0x2b   :  { %105 = vperm.xlu1 %1883, %v2098_v4  }
  0x2f   :  { %109 = vperm.xlu1 %1883, %v2100_v5  }
  0x33   :  { %1886 = vset.pattern.permute.xlu1 %v2716_v1 }
  0x93   :  { %v70_v8 = vpop.permute.xlu1 %69  ;;  %v43_v9 = vpop.permute.xlu0 %42 }
  0x94   :  { %v88_v23 = vmul.f32 %v87_v18, %v70_v8  ;;  %v64_v24 = vmul.f32 %v63_v19, %v43_v9 }
  0x96   :  { %v92_v28 = vadd.f32 %v88_v23, %v64_v24 }
  0x97   :  { %v48_v11 = vpop.permute.xlu0 %47  ;;  %v74_v12 = vpop.permute.xlu1 %73 }
  0x98   :  { %v89_v20 = vmul.f32 %v87_v18, %v74_v12  ;;  %v65_v21 = vmul.f32 %v63_v19, %v48_v11 }
  0x9a   :  { %v93_v26 = vadd.f32 %v89_v20, %v65_v21 }
  0x9b   :  { %v53_v16 = vpop.permute.xlu0 %52 }
  0x9c   :  { %v58_v17 = vpop.permute.xlu1 %57  ;;  %v66_v35 = vmul.f32 %v63_v19, %v53_v16 }
  0x9d   :  { %v67_v38 = vmul.f32 %v63_v19, %v58_v17 }
  0xa0   :  { %v78_v22 = vpop.permute.xlu0 %77 }
  0xa1   :  { %v82_v25 = vpop.permute.xlu1 %81  ;;  %v90_v33 = vmul.f32 %v87_v18, %v78_v22 }
  0xa2   :  { %v91_v39 = vmul.f32 %v87_v18, %v82_v25 }
  0xa3   :  { %v94_v37 = vadd.f32 %v90_v33, %v66_v35 }
  0xa4   :  { %v95_v42 = vadd.f32 %v91_v39, %v67_v38 }
  0xa5   :  { %v102_v27 = vpop.permute.xlu0 %101 }
  0xa6   :  { %v113_v29 = vadd.f32 %v102_v27, %v93_v26  ;;  %v98_v30 = vpop.permute.xlu1 %97  ;;  %v35_v26 = vld [vmem:[#allocation2 + $0x50] sm:$0xff] }
  0xa7   :  { %v112_v31 = vadd.f32 %v98_v30, %v92_v28  ;;  %v2267_v27 = vrot.slane %v35_v26, %v2120_v13  ;;  %v2270_v28 = vsub.s32 2, %v2117_v10  ;;  %v2707_v30 = vsub.s32 3, %v2117_v10 }
  0xa8   :  { %v2130_v32 = vmax.f32 %v113_v29, 0.0  ;;  %v2273_v29 = vrot.slane %v35_v26, %v2123_v14 }
  0xa9   :  { %v2132_v34 = vmax.f32 %v112_v31, 0.0  ;;  %v2278_v35 = vrot.slane %v35_v26, %v2270_v28 }
  0xaa   :  { %231 = vperm.xlu1 %1886, %v2130_v32   ;;  %v106_v36 = vpop.permute.xlu1 %105 }
  0xab   :  { %226 = vperm.xlu0 %1885, %v2132_v34   ;;  %v114_v40 = vadd.f32 %v106_v36, %v94_v37  ;;  %v2712_v36 = vsub.s32 4, %v2117_v10 }
  0xad   :  { %v2140_v43 = vmax.f32 %v114_v40, 0.0  ;;  %v2286_v40 = vrot.slane %v35_v26, %v2707_v30  ;;  %v410_v30 = vsub.s32 6, %v2117_v10 }
  0xae   :  { %1887 = vset.pattern.permute.xlu1 %v2705_v0  ;;  %v110_v41 = vpop.permute.xlu1 %109 }
  0xaf   :  { %1888 = vset.pattern.permute.xlu0 %v2705_v0  ;;  %253 = vperm.xlu1 %1887, %v2132_v34   ;;  %v115_v45 = vadd.f32 %v110_v41, %v95_v42  ;;  %v2713_v41 = vsub.s32 5, %v2117_v10 }
  0xb0   :  { %257 = vperm.xlu0 %1888, %v2130_v32  }
  0xb1   :  { %v2146_v46 = vmax.f32 %v115_v45, 0.0 }
  0xb3   :  { %1889 = vset.pattern.permute.xlu1 %v2714_v44 }
  0xb4   :  { %1890 = vset.pattern.permute.xlu0 %v2716_v1  ;;  %281 = vperm.xlu1 %1889, %v2132_v34  }
  0xb5   :  { %236 = vperm.xlu0 %1890, %v2140_v43  }
  0xb8   :  { %285 = vperm.xlu1 %1889, %v2130_v32  }
  0xb9   :  { %1893 = vset.pattern.permute.xlu0 %v2705_v0 }
  0xba   :  { %265 = vperm.xlu0 %1893, %v2146_v46  }
  0xbc   :  { %1891 = vset.pattern.permute.xlu1 %v2716_v1 }
  0xbd   :  { %241 = vperm.xlu1 %1891, %v2146_v46  }
  0xbe   :  { %1895 = vset.pattern.permute.xlu0 %v2714_v44 }
  0xbf   :  { %289 = vperm.xlu0 %1895, %v2140_v43  }
  0xc1   :  { %1892 = vset.pattern.permute.xlu1 %v2705_v0 }
  0xc2   :  { %261 = vperm.xlu1 %1892, %v2140_v43  }
  0xc3   :  { %1898 = vset.pattern.permute.xlu0 %v2718_v47 }
  0xc4   :  { %341 = vperm.xlu0 %1898, %v2130_v32  }
  0xc6   :  { %1894 = vset.pattern.permute.xlu1 %v2710_v48 }
  0xc7   :  { %309 = vperm.xlu1 %1894, %v2132_v34  }
  0xc8   :  { %1900 = vset.pattern.permute.xlu0 %v2708_v6 }
  0xc9   :  { %365 = vperm.xlu0 %1900, %v2132_v34  }
  0xcb   :  { %313 = vperm.xlu1 %1894, %v2130_v32  }
  0xcd   :  { %1903 = vset.pattern.permute.xlu0 %v2718_v47 }
  0xce   :  { %349 = vperm.xlu0 %1903, %v2146_v46  }
  0xcf   :  { %1896 = vset.pattern.permute.xlu1 %v2714_v44 }
  0xd0   :  { %293 = vperm.xlu1 %1896, %v2146_v46  }
  0xd2   :  { %1905 = vset.pattern.permute.xlu0 %v2708_v6 }
  0xd3   :  { %373 = vperm.xlu0 %1905, %v2140_v43  }
  0xd4   :  { %1897 = vset.pattern.permute.xlu1 %v2718_v47 }
  0xd5   :  { %337 = vperm.xlu1 %1897, %v2132_v34  }
  0xd7   :  { %1908 = vset.pattern.permute.xlu0 %v2701_v49 }
  0xd8   :  { %425 = vperm.xlu0 %1908, %v2130_v32  }
  0xd9   :  { %1899 = vset.pattern.permute.xlu1 %v2710_v48 }
  0xda   :  { %317 = vperm.xlu1 %1899, %v2140_v43  }
  0xdc   :  { %429 = vperm.xlu0 %1908, %v2140_v43  }
  0xde   :  { %321 = vperm.xlu1 %1899, %v2146_v46  }
  0xe0   :  { %468 = vrot.lane.b32.xlu0 %v2177_v50, %s2053_s24 }
  0xe1   :  { %1911 = vset.pattern.permute.xlu0 %v2714_v44 }
  0xe2   :  { %1901 = vset.pattern.permute.xlu1 %v2708_v6 }
  0xe3   :  { %369 = vperm.xlu1 %1901, %v2130_v32  }
  0xe4   :  { %472 = vrot.lane.b32.xlu0 %v2182_v51, %s2053_s24 }
  0xe7   :  { %1902 = vset.pattern.permute.xlu1 %v2718_v47 }
  0xe8   :  { %345 = vperm.xlu1 %1902, %v2140_v43   ;;  %121 = vperm.xlu0 %1911, %v2090_v2  }
  0xec   :  { %1904 = vset.pattern.permute.xlu1 %v2703_v52  ;;  %129 = vperm.xlu0 %1911, %v2098_v4  }
  0xed   :  { %393 = vperm.xlu1 %1904, %v2132_v34  }
  0xf0   :  { %1915 = vset.pattern.permute.xlu0 %v2710_v48 }
  0xf1   :  { %397 = vperm.xlu1 %1904, %v2130_v32   ;;  %149 = vperm.xlu0 %1915, %v2094_v3  }
  0xf5   :  { %1906 = vset.pattern.permute.xlu1 %v2708_v6  ;;  %157 = vperm.xlu0 %1915, %v2100_v5  }
  0xf6   :  { %377 = vperm.xlu1 %1906, %v2146_v46  }
  0xf9   :  { %1919 = vset.pattern.permute.xlu0 %v2703_v52 }
  0xfa   :  { %1907 = vset.pattern.permute.xlu1 %v2701_v49  ;;  %201 = vperm.xlu0 %1919, %v2090_v2  }
  0xfb   :  { %421 = vperm.xlu1 %1907, %v2132_v34  }
  0xfe   :  { %1922 = vset.pattern.permute.xlu0 %v2701_v49 }
  0xff   :  { %1909 = vset.pattern.permute.xlu1 %v2703_v52  ;;  %453 = vperm.xlu0 %1922, %v2094_v3  }
 0x100   :  { %401 = vperm.xlu1 %1909, %v2140_v43  }
 0x103   :  { %457 = vperm.xlu0 %1922, %v2098_v4  }
 0x104   :  { %405 = vperm.xlu1 %1909, %v2146_v46  }
 0x107   :  { %1926 = vset.pattern.permute.xlu0 %v2705_v0 }
 0x108   :  { %1910 = vset.pattern.permute.xlu1 %v2701_v49 }
 0x109   :  { %433 = vperm.xlu1 %1910, %v2146_v46  }
 0x10d   :  { %470 = vrot.lane.b32.xlu1 %v2214_v53, %s2053_s24 }
 0x10e   :  { %1912 = vset.pattern.permute.xlu1 %v2714_v44 }
 0x111   :  { %474 = vrot.lane.b32.xlu1 %v2218_v54, %s2053_s24 }
 0x115   :  { %125 = vperm.xlu1 %1912, %v2094_v3  }
 0x119   :  { %1913 = vset.pattern.permute.xlu1 %v2710_v48 }
 0x11a   :  { %145 = vperm.xlu1 %1913, %v2090_v2  }
 0x11e   :  { %1914 = vset.pattern.permute.xlu1 %v2718_v47 }
 0x11f   :  { %173 = vperm.xlu1 %1914, %v2090_v2  }
 0x123   :  { %177 = vperm.xlu1 %1914, %v2094_v3  }
 0x127   :  { %1916 = vset.pattern.permute.xlu1 %v2714_v44 }
 0x128   :  { %133 = vperm.xlu1 %1916, %v2100_v5  }
 0x129   :  { %v232_v55 = vpop.permute.xlu1 %231 }
 0x12a   :  { %v227_v56 = vpop.permute.xlu0 %226  ;;  %v249_v37 = vmul.f32 %v2273_v29, %v232_v55  ;;  %v2294_v55 = vrot.slane %v35_v26, %v2712_v36 }
 0x12b   :  { %v248_v45 = vmul.f32 %v2273_v29, %v227_v56  ;;  %v2300_v56 = vrot.slane %v35_v26, %v2713_v41 }
 0x12c   :  { %1917 = vset.pattern.permute.xlu1 %v2710_v48 }
 0x12d   :  { %153 = vperm.xlu1 %1917, %v2098_v4  }
 0x12e   :  { %v254_v57 = vpop.permute.xlu1 %253 }
 0x12f   :  { %v258_v58 = vpop.permute.xlu0 %257  ;;  %v272_v38 = vmul.f32 %v2267_v27, %v254_v57 }
 0x130   :  { %v273_v33 = vmul.f32 %v2267_v27, %v258_v58 }
 0x131   :  { %1918 = vset.pattern.permute.xlu1 %v2718_v47  ;;  %v276_v57 = vadd.f32 %v272_v38, %v248_v45 }
 0x132   :  { %181 = vperm.xlu1 %1918, %v2098_v4   ;;  %v277_v58 = vadd.f32 %v273_v33, %v249_v37 }
 0x133   :  { %v282_v59 = vpop.permute.xlu1 %281 }
 0x134   :  { %v2235_v60 = vpop.permute.xlu0 %236 }
 0x136   :  { %185 = vperm.xlu1 %1918, %v2100_v5  }
 0x137   :  { %v286_v61 = vpop.permute.xlu1 %285 }
 0x138   :  { %v301_v39 = vmul.f32 %v2278_v35, %v286_v61 }
 0x139   :  { %v2238_v62 = vpop.permute.xlu0 %265 }
 0x13a   :  { %1920 = vset.pattern.permute.xlu1 %v2703_v52  ;;  %v305_v61 = vadd.f32 %v301_v39, %v277_v58  ;;  %v2306_v39 = vrot.slane %v35_v26, %v410_v30 }
 0x13b   :  { %205 = vperm.xlu1 %1920, %v2094_v3  }
 0x13c   :  { %v2242_v63 = vpop.permute.xlu1 %241 }
 0x13e   :  { %v2244_v7 = vpop.permute.xlu0 %289 }
 0x13f   :  { %1921 = vset.pattern.permute.xlu1 %v2701_v49 }
 0x140   :  { %449 = vperm.xlu1 %1921, %v2090_v2  }
 0x141   :  { %v262_v8 = vpop.permute.xlu1 %261 }
 0x143   :  { %v342_v9 = vpop.permute.xlu0 %341 }
 0x144   :  { %1923 = vset.pattern.permute.xlu1 %v2703_v52  ;;  %v357_v37 = vmul.f32 %v2294_v55, %v342_v9 }
 0x145   :  { %209 = vperm.xlu1 %1923, %v2098_v4  }
 0x146   :  { %v310_v11 = vpop.permute.xlu1 %309 }
 0x147   :  { %v328_v0 = vmul.f32 %v2286_v40, %v310_v11  ;;  %v274_v11 = vmul.f32 %v2267_v27, %v262_v8 }
 0x148   :  { %v366_v12 = vpop.permute.xlu0 %365 }
 0x149   :  { %213 = vperm.xlu1 %1923, %v2100_v5  }
 0x14a   :  { %v314_v15 = vpop.permute.xlu1 %313 }
 0x14b   :  { %v329_v52 = vmul.f32 %v2286_v40, %v314_v15  ;;  %v438_v15 = vsub.s32 7, %v2117_v10 }
 0x14d   :  { %v2251_v16 = vpop.permute.xlu0 %349  ;;  %1924 = vset.pattern.permute.xlu1 %v2701_v49  ;;  %v300_v49 = vmul.f32 %v2278_v35, %v282_v59  ;;  %v333_v33 = vadd.f32 %v329_v52, %v305_v61  ;;  %v250_v52 = vmul.f32 %v2273_v29, %v2235_v60  ;;  %v2313_v61 = vrot.slane %v35_v26, %v438_v15 }
 0x14e   :  { %461 = vperm.xlu1 %1924, %v2100_v5  }
 0x14f   :  { %v294_v17 = vpop.permute.xlu1 %293  ;;  %v304_v48 = vadd.f32 %v300_v49, %v276_v57  ;;  %v361_v49 = vadd.f32 %v357_v37, %v333_v33 }
 0x150   :  { %v303_v60 = vmul.f32 %v2278_v35, %v294_v17 }
 0x151   :  { %v332_v36 = vadd.f32 %v328_v0, %v304_v48  ;;  %v251_v48 = vmul.f32 %v2273_v29, %v2242_v63 }
 0x152   :  { %v2255_v18 = vpop.permute.xlu0 %373  ;;  %1925 = vset.pattern.permute.xlu1 %v2716_v1 }
 0x154   :  { %v338_v19 = vpop.permute.xlu1 %337 }
 0x155   :  { %v356_v59 = vmul.f32 %v2294_v55, %v338_v19  ;;  %v384_v19 = vmul.f32 %v2300_v56, %v366_v12 }
 0x157   :  { %v426_v20 = vpop.permute.xlu0 %425  ;;  %v360_v45 = vadd.f32 %v356_v59, %v332_v36  ;;  %v302_v36 = vmul.f32 %v2278_v35, %v2244_v7 }
 0x158   :  { %v441_v26 = vmul.f32 %v2313_v61, %v426_v20 }
 0x159   :  { %v318_v21 = vpop.permute.xlu1 %317  ;;  %v388_v8 = vadd.f32 %v384_v19, %v360_v45 }
 0x15a   :  { %v330_v33 = vmul.f32 %v2286_v40, %v318_v21  ;;  %v359_v21 = vmul.f32 %v2294_v55, %v2251_v16 }
 0x15b   :  { %v2258_v22 = vpop.permute.xlu0 %429 }
 0x15d   :  { %v2260_v23 = vpop.permute.xlu1 %321 }
 0x15e   :  { %v331_v37 = vmul.f32 %v2286_v40, %v2260_v23 }
 0x15f   :  { %v2262_v24 = vpop.permute.xlu0 %468 }
 0x160   :  { %1742 = vmatprep.mubr.msk.f32.mxu0 %vm476_vm0, %v2262_v24 }
 0x162   :  { %v370_v25 = vpop.permute.xlu1 %369 }
 0x163   :  { %v385_v38 = vmul.f32 %v2300_v56, %v370_v25  ;;  %v278_v25 = vadd.f32 %v274_v11, %v250_v52  ;;  %v386_v52 = vmul.f32 %v2300_v56, %v2255_v18 }
 0x165   :  { %v389_v9 = vadd.f32 %v385_v38, %v361_v49  ;;  %v306_v15 = vadd.f32 %v302_v36, %v278_v25 }
 0x167   :  { %v346_v31 = vpop.permute.xlu1 %345  ;;  %v334_v45 = vadd.f32 %v330_v33, %v306_v15 }
 0x16c   :  { %v394_v42 = vpop.permute.xlu1 %393 }
 0x16d   :  { %v412_v0 = vmul.f32 %v2306_v39, %v394_v42 }
 0x16f   :  { %v416_v42 = vadd.f32 %v412_v0, %v388_v8 }
 0x170   :  { %v398_v6 = vpop.permute.xlu1 %397 }
 0x171   :  { %v413_v58 = vmul.f32 %v2306_v39, %v398_v6  ;;  %v275_v6 = vmul.f32 %v2267_v27, %v2238_v62  ;;  %v358_v62 = vmul.f32 %v2294_v55, %v346_v31 }
 0x173   :  { %v417_v30 = vadd.f32 %v413_v58, %v389_v9  ;;  %v279_v63 = vadd.f32 %v275_v6, %v251_v48  ;;  %v362_v20 = vadd.f32 %v358_v62, %v334_v45  ;;  %v442_v6 = vmul.f32 %v2313_v61, %v2258_v22 }
 0x175   :  { %v378_v57 = vpop.permute.xlu1 %377  ;;  %v445_v11 = vadd.f32 %v441_v26, %v417_v30  ;;  %v307_v7 = vadd.f32 %v303_v60, %v279_v63  ;;  %v390_v0 = vadd.f32 %v386_v52, %v362_v20  ;;  %v2341_v26 = vpop.permute.xlu0 %472 }
 0x176   :  { %v387_v23 = vmul.f32 %v2300_v56, %v378_v57 }
 0x177   :  { %v335_v58 = vadd.f32 %v331_v37, %v307_v7 }
 0x179   :  { %v363_v9 = vadd.f32 %v359_v21, %v335_v58  ;;  %v122_v37 = vpop.permute.xlu0 %121 }
 0x17a   :  { %v422_v12 = vpop.permute.xlu1 %421 }
 0x17b   :  { %v440_v59 = vmul.f32 %v2313_v61, %v422_v12  ;;  %v391_v25 = vadd.f32 %v387_v23, %v363_v9 }
 0x17d   :  { %v444_v38 = vadd.f32 %v440_v59, %v416_v42 }
 0x17f   :  { %v402_v17 = vpop.permute.xlu1 %401  ;;  %v1812_v49 = vpack.c.bf16 %v445_v11, %v444_v38  ;;  %v130_v38 = vpop.permute.xlu0 %129  ;;  %v39_v11 = vld [vmem:[%s2699_s1 + $0x2] sm:$0x7]  ;;  %s2055_s1 = smov 32  }
 0x180   :  { %v414_v31 = vmul.f32 %v2306_v39, %v402_v17  ;;  %v139_v45 = vrot.slane %v39_v11, %v2123_v14  ;;  %v163_v17 = vrot.slane %v39_v11, %v2120_v13  ;;  %v191_v20 = vrot.slane %v39_v11, %v2270_v28 }
 0x181   :  { %1813 = vmatprep.subr.bf16.mxu0 %v1812_v49 }
 0x182   :  { %1815 = vmatpush3.bf16.msra.mxu0 %v1812_v49  ;;  %v418_v8 = vadd.f32 %v414_v31, %v390_v0  ;;  %v140_v0 = vmul.f32 %v139_v45, %v122_v37 }
 0x183   :  { %v406_v19 = vpop.permute.xlu1 %405  ;;  %v150_v49 = vpop.permute.xlu0 %149 }
 0x184   :  { %v415_v48 = vmul.f32 %v2306_v39, %v406_v19  ;;  %v446_v60 = vadd.f32 %v442_v6, %v418_v8  ;;  %v165_v21 = vmul.f32 %v163_v17, %v150_v49 }
 0x186   :  { %v419_v36 = vadd.f32 %v415_v48, %v391_v25 }
 0x187   :  { %v158_v52 = vpop.permute.xlu0 %157 }
 0x188   :  { %v434_v30 = vpop.permute.xlu1 %433  ;;  %v167_v37 = vmul.f32 %v163_v17, %v158_v52 }
 0x189   :  { %v443_v16 = vmul.f32 %v2313_v61, %v434_v30 }
 0x18b   :  { %v447_v18 = vadd.f32 %v443_v16, %v419_v36  ;;  %v202_v25 = vpop.permute.xlu0 %201 }
 0x18c   :  { %v2339_v57 = vpop.permute.xlu1 %470 }
 0x18d   :  { %v1816_v12 = vpack.c.bf16 %v447_v18, %v446_v60 }
 0x18f   :  { %1817 = vmatprep.subr.bf16.mxu0 %v1816_v12  ;;  %v2361_v16 = vpop.permute.xlu0 %453 }
 0x190   :  { %1819 = vmatpush3.bf16.msra.mxu0 %v1816_v12  ;;  %v2345_v33 = vpop.permute.xlu1 %474 }
 0x193   :  { %1743 = vmatmul.mubr.msk.f32.vlgmr.msra.gmra.mrb[0].mxu0 %vm476_vm0, %v2339_v57 }
 0x194   :  { %1745 = vmatprep.mubr.msk.f32.mxu0 %vm476_vm0, %v2341_v26  ;;  %v126_v22 = vpop.permute.xlu1 %125 }
 0x197   :  { %1746 = vmatmul.mubr.msk.f32.gmra.mrb[2].mxu0 %vm476_vm0, %v2345_v33 }
 0x198   :  { %1770 = vmatprep.mubr.msk.f32.mxu0 %vm476_vm0, %v2262_v24  ;;  %v141_v24 = vmul.f32 %v139_v45, %v126_v22 }
 0x199   :  { %v146_v42 = vpop.permute.xlu1 %145 }
 0x19a   :  { %v169_v31 = vadd.f32 %v165_v21, %v141_v24  ;;  %v164_v9 = vmul.f32 %v163_v17, %v146_v42 }
 0x19c   :  { %v168_v6 = vadd.f32 %v164_v9, %v140_v0 }
 0x19e   :  { %v174_v59 = vpop.permute.xlu1 %173 }
 0x19f   :  { %v192_v30 = vmul.f32 %v191_v20, %v174_v59 }
 0x1a2   :  { %v178_v63 = vpop.permute.xlu1 %177 }
 0x1a3   :  { %v193_v23 = vmul.f32 %v191_v20, %v178_v63  ;;  %v196_v63 = vadd.f32 %v192_v30, %v168_v6  ;;  %v142_v6 = vmul.f32 %v139_v45, %v130_v38 }
 0x1a5   :  { %v197_v48 = vadd.f32 %v193_v23, %v169_v31  ;;  %v216_v59 = vadd.f32 %v202_v25, %v196_v63 }
 0x1a7   :  { %v134_v15 = vpop.permute.xlu1 %133 }
 0x1a8   :  { %v143_v42 = vmul.f32 %v139_v45, %v134_v15  ;;  %v2721_v45 = vmov 3  }
 0x1ac   :  { %v154_v62 = vpop.permute.xlu1 %153 }
 0x1ad   :  { %v166_v30 = vmul.f32 %v163_v17, %v154_v62 }
 0x1af   :  { %v170_v25 = vadd.f32 %v166_v30, %v142_v6  ;;  %v34_v30 = vld [vmem:[#allocation2 + $0x40] sm:$0x3f] }
 0x1b0   :  { %v2441_v6 = vrot.slane %v34_v30, %v2270_v28  ;;  %v2725_v28 = vsub.s32 4, %v2117_v10 }
 0x1b1   :  { %v182_v7 = vpop.permute.xlu1 %181 }
 0x1b5   :  { %v186_v58 = vpop.permute.xlu1 %185 }
 0x1b6   :  { %v195_v0 = vmul.f32 %v191_v20, %v186_v58 }
 0x1ba   :  { %v206_v19 = vpop.permute.xlu1 %205 }
 0x1bb   :  { %v217_v36 = vadd.f32 %v206_v19, %v197_v48  ;;  %v171_v48 = vadd.f32 %v167_v37, %v143_v42 }
 0x1bd   :  { %v221_v11 = vmax.f32 %v217_v36, 0.0  ;;  %v220_v36 = vmax.f32 %v216_v59, 0.0  ;;  %v199_v52 = vadd.f32 %v195_v0, %v171_v48 }
 0x1bf   :  { %v2359_v8 = vpop.permute.xlu1 %449 }
 0x1c4   :  { %v210_v22 = vpop.permute.xlu1 %209 }
 0x1c8   :  { %v214_v19 = vpop.permute.xlu1 %213 }
 0x1cd   :  { %v2369_v15 = vpop.permute.xlu1 %461 }
 0x266   :  { %v1744_v60 = vpop.f32.mrb[0].mxu0 }
 0x267   :  { %v557_v18 = vadd.f32 %v1744_v60, %v2361_v16  ;;  %v551_v12 = vpop.f32.mrb[1].mxu0 }
 0x268   :  { %v552_v23 = vadd.f32 %v551_v12, %v2359_v8  ;;  %v219_v12 = vadd.f32 %v214_v19, %v199_v52 }
 0x269   :  { %v571_v49 = vmax.f32 %v557_v18, 0.0  ;;  %v194_v18 = vmul.f32 %v191_v20, %v182_v7 }
 0x26a   :  { %v1747_v24 = vpop.f32.mrb[2].mxu0  ;;  %v570_v41 = vmax.f32 %v552_v23, 0.0  ;;  %v223_v20 = vmax.f32 %v219_v12, 0.0  ;;  %v2723_v23 = vmov 1  }
 0x26b   :  { %v575_v21 = vadd.f32 %v571_v49, %v221_v11  ;;  %v561_v31 = vpop.f32.mrb[3].mxu0  ;;  %v567_v58 = vadd.f32 %v1747_v24, %v2369_v15  ;;  %v198_v38 = vadd.f32 %v194_v18, %v170_v25  ;;  %v2722_v49 = vmov 5  }
 0x26c   :  { %v574_v60 = vadd.f32 %v570_v41, %v220_v36  ;;  %v2380_v41 = vpop.permute.xlu0 %457 }
 0x26d   :  { %v2365_v9 = vmax.f32 %v575_v21, 0.0  ;;  %v573_v17 = vmax.f32 %v567_v58, 0.0  ;;  %v562_v7 = vadd.f32 %v561_v31, %v2380_v41  ;;  %v218_v11 = vadd.f32 %v210_v22, %v198_v38 }
 0x26e   :  { %v2376_v62 = vmax.f32 %v574_v60, 0.0  ;;  %v2724_v60 = vsub.s32 3, %v2117_v10 }
 0x26f   :  { %615 = vperm.xlu0 %1926, %v2365_v9   ;;  %589 = vperm.xlu1 %1925, %v2365_v9   ;;  %v577_v63 = vadd.f32 %v573_v17, %v223_v20  ;;  %v572_v24 = vmax.f32 %v562_v7, 0.0  ;;  %v222_v42 = vmax.f32 %v218_v11, 0.0  ;;  %v2454_v7 = vrot.slane %v34_v30, %v2725_v28 }
 0x270   :  { %v2447_v25 = vrot.slane %v34_v30, %v2724_v60 }
 0x271   :  { %v2389_v37 = vmax.f32 %v577_v63, 0.0  ;;  %v576_v21 = vadd.f32 %v572_v24, %v222_v42 }
 0x273   :  { %1929 = vset.pattern.permute.xlu0 %v2718_v47  ;;  %1927 = vset.pattern.permute.xlu1 %v2714_v44  ;;  %v2395_v22 = vmax.f32 %v576_v21, 0.0  ;;  %v2726_v21 = vsub.s32 5, %v2117_v10 }
 0x274   :  { %699 = vperm.xlu0 %1929, %v2365_v9   ;;  %643 = vperm.xlu1 %1927, %v2365_v9  }
 0x278   :  { %1931 = vset.pattern.permute.xlu0 %v2716_v1  ;;  %1928 = vset.pattern.permute.xlu1 %v2721_v45 }
 0x279   :  { %584 = vperm.xlu0 %1931, %v2376_v62   ;;  %671 = vperm.xlu1 %1928, %v2365_v9  }
 0x27d   :  { %1936 = vset.pattern.permute.xlu0 %v2722_v49  ;;  %1930 = vset.pattern.permute.xlu1 %v2722_v49 }
 0x27e   :  { %723 = vperm.xlu0 %1936, %v2376_v62   ;;  %727 = vperm.xlu1 %1930, %v2365_v9  }
 0x282   :  { %1938 = vset.pattern.permute.xlu0 %v2723_v23  ;;  %1932 = vset.pattern.permute.xlu1 %v2723_v23 }
 0x283   :  { %623 = vperm.xlu0 %1938, %v2389_v37   ;;  %611 = vperm.xlu1 %1932, %v2376_v62  }
 0x287   :  { %1941 = vset.pattern.permute.xlu0 %v2716_v1  ;;  %1933 = vset.pattern.permute.xlu1 %v2714_v44 }
 0x288   :  { %639 = vperm.xlu1 %1933, %v2376_v62   ;;  %594 = vperm.xlu0 %1941, %v2395_v22  }
 0x28c   :  { %1934 = vset.pattern.permute.xlu1 %v2721_v45  ;;  %1943 = vset.pattern.permute.xlu0 %v2714_v44 }
 0x28d   :  { %667 = vperm.xlu1 %1934, %v2376_v62   ;;  %647 = vperm.xlu0 %1943, %v2395_v22  }
 0x291   :  { %1935 = vset.pattern.permute.xlu1 %v2718_v47  ;;  %1944 = vset.pattern.permute.xlu0 %v2718_v47 }
 0x292   :  { %695 = vperm.xlu1 %1935, %v2376_v62   ;;  %707 = vperm.xlu0 %1944, %v2389_v37  }
 0x296   :  { %1937 = vset.pattern.permute.xlu1 %v2716_v1  ;;  %766 = vrot.lane.b32.xlu0 %v2177_v50, %s2055_s1  ;;  %v2056_v50 = vmov 8  }
 0x297   :  { %599 = vperm.xlu1 %1937, %v2389_v37   ;;  %1948 = vset.pattern.permute.xlu0 %v2056_v50 }
 0x29a   :  { %770 = vrot.lane.b32.xlu0 %v2182_v51, %s2055_s1 }
 0x29b   :  { %1939 = vset.pattern.permute.xlu1 %v2714_v44 }
 0x29c   :  { %651 = vperm.xlu1 %1939, %v2389_v37  }
 0x29e   :  { %751 = vperm.xlu0 %1948, %v2090_v2   ;;  %v2438_v2 = vrot.slane %v34_v30, %v2123_v14 }
 0x2a0   :  { %1940 = vset.pattern.permute.xlu1 %v2721_v45 }
 0x2a1   :  { %679 = vperm.xlu1 %1940, %v2389_v37  }
 0x2a2   :  { %763 = vperm.xlu0 %1948, %v2100_v5  }
 0x2a5   :  { %1942 = vset.pattern.permute.xlu1 %v2723_v23 }
 0x2a6   :  { %619 = vperm.xlu1 %1942, %v2395_v22   ;;  %1950 = vset.pattern.permute.xlu0 %v2716_v1 }
 0x2aa   :  { %1945 = vset.pattern.permute.xlu1 %v2721_v45 }
 0x2ab   :  { %675 = vperm.xlu1 %1945, %v2395_v22  }
 0x2af   :  { %1946 = vset.pattern.permute.xlu1 %v2718_v47 }
 0x2b0   :  { %703 = vperm.xlu1 %1946, %v2395_v22  }
 0x2b4   :  { %1947 = vset.pattern.permute.xlu1 %v2722_v49 }
 0x2b5   :  { %731 = vperm.xlu1 %1947, %v2395_v22  }
 0x2b9   :  { %735 = vperm.xlu1 %1947, %v2389_v37  }
 0x2bd   :  { %768 = vrot.lane.b32.xlu1 %v2214_v53, %s2055_s1 }
 0x2be   :  { %1949 = vset.pattern.permute.xlu1 %v2056_v50  ;;  %v2460_v50 = vrot.slane %v34_v30, %v2726_v21 }
 0x2c1   :  { %772 = vrot.lane.b32.xlu1 %v2218_v54, %s2055_s1 }
 0x2c5   :  { %755 = vperm.xlu1 %1949, %v2094_v3   ;;  %v2435_v3 = vrot.slane %v34_v30, %v2120_v13 }
 0x2c9   :  { %759 = vperm.xlu1 %1949, %v2098_v4  }
 0x2cd   :  { %1951 = vset.pattern.permute.xlu1 %v2723_v23 }
 0x2ee   :  { %v590_v51 = vpop.permute.xlu1 %589  ;;  %v616_v31 = vpop.permute.xlu0 %615 }
 0x2ef   :  { %v607_v36 = vmul.f32 %v2438_v2, %v590_v51  ;;  %v631_v52 = vmul.f32 %v2435_v3, %v616_v31 }
 0x2f1   :  { %v635_v12 = vadd.f32 %v631_v52, %v607_v36 }
 0x2f3   :  { %v644_v53 = vpop.permute.xlu1 %643  ;;  %v700_v59 = vpop.permute.xlu0 %699 }
 0x2f4   :  { %v659_v13 = vmul.f32 %v2441_v6, %v644_v53  ;;  %v715_v53 = vmul.f32 %v2454_v7, %v700_v59 }
 0x2f6   :  { %v663_v17 = vadd.f32 %v659_v13, %v635_v12 }
 0x2f8   :  { %v672_v54 = vpop.permute.xlu1 %671  ;;  %v585_v19 = vpop.permute.xlu0 %584 }
 0x2f9   :  { %v687_v14 = vmul.f32 %v2447_v25, %v672_v54  ;;  %v606_v20 = vmul.f32 %v2438_v2, %v585_v19 }
 0x2fb   :  { %v691_v42 = vadd.f32 %v687_v14, %v663_v17 }
 0x2fd   :  { %v728_v0 = vpop.permute.xlu1 %727  ;;  %v724_v48 = vpop.permute.xlu0 %723 }
 0x2fe   :  { %v743_v52 = vmul.f32 %v2460_v50, %v728_v0  ;;  %v742_v13 = vmul.f32 %v2460_v50, %v724_v48 }
 0x302   :  { %v612_v4 = vpop.permute.xlu1 %611  ;;  %v624_v5 = vpop.permute.xlu0 %623 }
 0x303   :  { %v630_v38 = vmul.f32 %v2435_v3, %v612_v4 }
 0x305   :  { %v634_v51 = vadd.f32 %v630_v38, %v606_v20 }
 0x307   :  { %v640_v18 = vpop.permute.xlu1 %639  ;;  %v595_v58 = vpop.permute.xlu0 %594 }
 0x308   :  { %v658_v11 = vmul.f32 %v2441_v6, %v640_v18  ;;  %v719_v18 = vadd.f32 %v715_v53, %v691_v42  ;;  %v633_v42 = vmul.f32 %v2435_v3, %v624_v5 }
 0x30a   :  { %v662_v54 = vadd.f32 %v658_v11, %v634_v51  ;;  %v747_v38 = vadd.f32 %v743_v52, %v719_v18 }
 0x30c   :  { %v668_v63 = vpop.permute.xlu1 %667  ;;  %v648_v24 = vpop.permute.xlu0 %647 }
 0x30d   :  { %v686_v31 = vmul.f32 %v2447_v25, %v668_v63  ;;  %v608_v63 = vmul.f32 %v2438_v2, %v595_v58  ;;  %v660_v53 = vmul.f32 %v2441_v6, %v648_v24 }
 0x30f   :  { %v690_v19 = vadd.f32 %v686_v31, %v662_v54 }
 0x311   :  { %v696_v4 = vpop.permute.xlu1 %695  ;;  %v708_v36 = vpop.permute.xlu0 %707 }
 0x312   :  { %v714_v60 = vmul.f32 %v2454_v7, %v696_v4 }
 0x314   :  { %v718_v12 = vadd.f32 %v714_v60, %v690_v19 }
 0x315   :  { %v767_v10 = vpop.permute.xlu0 %766 }
 0x316   :  { %v600_v30 = vpop.permute.xlu1 %599  ;;  %v746_v14 = vadd.f32 %v742_v13, %v718_v12  ;;  %1756 = vmatprep.mubr.msk.f32.mxu1 %vm476_vm0, %v767_v10  ;;  %v717_v12 = vmul.f32 %v2454_v7, %v708_v36 }
 0x317   :  { %v609_v48 = vmul.f32 %v2438_v2, %v600_v30 }
 0x318   :  { %v1820_v17 = vpack.c.bf16 %v747_v38, %v746_v14 }
 0x319   :  { %v637_v54 = vadd.f32 %v633_v42, %v609_v48 }
 0x31a   :  { %1821 = vmatprep.subr.bf16.mxu1 %v1820_v17 }
 0x31b   :  { %v652_v59 = vpop.permute.xlu1 %651  ;;  %1823 = vmatpush3.bf16.msra.mxu1 %v1820_v17 }
 0x31c   :  { %v661_v21 = vmul.f32 %v2441_v6, %v652_v59 }
 0x31e   :  { %v665_v52 = vadd.f32 %v661_v21, %v637_v54 }
 0x320   :  { %v680_v28 = vpop.permute.xlu1 %679 }
 0x321   :  { %v689_v4 = vmul.f32 %v2447_v25, %v680_v28 }
 0x323   :  { %v693_v13 = vadd.f32 %v689_v4, %v665_v52 }
 0x325   :  { %v620_v20 = vpop.permute.xlu1 %619  ;;  %v721_v17 = vadd.f32 %v717_v12, %v693_v13  ;;  %v2727_v12 = vmov 6  }
 0x326   :  { %v632_v11 = vmul.f32 %v2435_v3, %v620_v20 }
 0x328   :  { %v636_v51 = vadd.f32 %v632_v11, %v608_v63 }
 0x32a   :  { %v676_v0 = vpop.permute.xlu1 %675  ;;  %v664_v19 = vadd.f32 %v660_v53, %v636_v51 }
 0x32b   :  { %v688_v60 = vmul.f32 %v2447_v25, %v676_v0  ;;  %v2482_v0 = vpop.permute.xlu0 %770 }
 0x32d   :  { %v692_v5 = vadd.f32 %v688_v60, %v664_v19 }
 0x32f   :  { %v704_v31 = vpop.permute.xlu1 %703  ;;  %v2496_v51 = vpop.permute.xlu0 %751 }
 0x330   :  { %v716_v58 = vmul.f32 %v2454_v7, %v704_v31 }
 0x332   :  { %v720_v38 = vadd.f32 %v716_v58, %v692_v5 }
 0x334   :  { %v732_v18 = vpop.permute.xlu1 %731 }
 0x335   :  { %v744_v30 = vmul.f32 %v2460_v50, %v732_v18  ;;  %v2511_v18 = vpop.permute.xlu0 %763 }
 0x337   :  { %v748_v59 = vadd.f32 %v744_v30, %v720_v38  ;;  %v2729_v30 = vmov 7  }
 0x338   :  { %v736_v14 = vpop.permute.xlu1 %735 }
 0x339   :  { %v745_v24 = vmul.f32 %v2460_v50, %v736_v14 }
 0x33b   :  { %v749_v28 = vadd.f32 %v745_v24, %v721_v17 }
 0x33c   :  { %v2480_v11 = vpop.permute.xlu1 %768 }
 0x33d   :  { %v1824_v20 = vpack.c.bf16 %v749_v28, %v748_v59 }
 0x33f   :  { %1825 = vmatprep.subr.bf16.mxu1 %v1824_v20 }
 0x340   :  { %1827 = vmatpush3.bf16.msra.mxu1 %v1824_v20  ;;  %v2486_v36 = vpop.permute.xlu1 %772 }
 0x343   :  { %1757 = vmatmul.mubr.msk.f32.vlgmr.msra.gmra.mrb[0].mxu1 %vm476_vm0, %v2480_v11 }
 0x344   :  { %1759 = vmatprep.mubr.msk.f32.mxu1 %vm476_vm0, %v2482_v0  ;;  %v2493_v63 = vpop.permute.xlu1 %755 }
 0x347   :  { %1760 = vmatmul.mubr.msk.f32.gmra.mrb[2].mxu1 %vm476_vm0, %v2486_v36 }
 0x348   :  { %1784 = vmatprep.mubr.msk.f32.mxu1 %vm476_vm0, %v767_v10  ;;  %v2531_v14 = vpop.permute.xlu1 %759 }
 0x416   :  { %v1758_v48 = vpop.f32.mrb[0].mxu1 }
 0x417   :  { %v854_v42 = vadd.f32 %v1758_v48, %v2493_v63  ;;  %v848_v21 = vpop.f32.mrb[1].mxu1 }
 0x418   :  { %v849_v4 = vadd.f32 %v848_v21, %v2496_v51 }
 0x419   :  { %v868_v31 = vmax.f32 %v854_v42, 0.0 }
 0x41a   :  { %v1761_v53 = vpop.f32.mrb[2].mxu1  ;;  %v867_v60 = vmax.f32 %v849_v4, 0.0 }
 0x41b   :  { %v872_v54 = vadd.f32 %v868_v31, %v2130_v32  ;;  %v858_v52 = vpop.f32.mrb[3].mxu1 }
 0x41c   :  { %v871_v10 = vadd.f32 %v867_v60, %v2132_v34  ;;  %v864_v34 = vadd.f32 %v1761_v53, %v2511_v18 }
 0x41d   :  { %v2500_v19 = vmax.f32 %v872_v54, 0.0 }
 0x41e   :  { %v2509_v32 = vmax.f32 %v871_v10, 0.0  ;;  %v870_v13 = vmax.f32 %v864_v34, 0.0 }
 0x41f   :  { %908 = vperm.xlu1 %1951, %v2500_v19   ;;  %886 = vperm.xlu0 %1950, %v2500_v19  }
 0x420   :  { %v874_v58 = vadd.f32 %v870_v13, %v2146_v46  ;;  %v859_v46 = vadd.f32 %v858_v52, %v2531_v14 }
 0x422   :  { %v2527_v5 = vmax.f32 %v874_v58, 0.0  ;;  %v869_v38 = vmax.f32 %v859_v46, 0.0 }
 0x423   :  { %1952 = vset.pattern.permute.xlu1 %v2714_v44  ;;  %1955 = vset.pattern.permute.xlu0 %v2722_v49 }
 0x424   :  { %932 = vperm.xlu1 %1952, %v2500_v19   ;;  %1004 = vperm.xlu0 %1955, %v2500_v19   ;;  %2728 = vst [vmem:[#allocation5_spill] sm:$0xff] %v2527_v5  ;;  %v873_v17 = vadd.f32 %v869_v38, %v2140_v43 }
 0x426   :  { %v2545_v24 = vmax.f32 %v873_v17, 0.0 }
 0x428   :  { %1953 = vset.pattern.permute.xlu1 %v2721_v45  ;;  %1960 = vset.pattern.permute.xlu0 %v2714_v44 }
 0x429   :  { %956 = vperm.xlu1 %1953, %v2500_v19   ;;  %928 = vperm.xlu0 %1960, %v2509_v32  }
 0x42d   :  { %1954 = vset.pattern.permute.xlu1 %v2718_v47  ;;  %1961 = vset.pattern.permute.xlu0 %v2721_v45 }
 0x42e   :  { %980 = vperm.xlu1 %1954, %v2500_v19   ;;  %952 = vperm.xlu0 %1961, %v2509_v32  }
 0x432   :  { %1956 = vset.pattern.permute.xlu1 %v2727_v12  ;;  %1964 = vset.pattern.permute.xlu0 %v2727_v12 }
 0x433   :  { %1028 = vperm.xlu1 %1956, %v2500_v19   ;;  %1024 = vperm.xlu0 %1964, %v2509_v32  }
 0x437   :  { %1957 = vset.pattern.permute.xlu1 %v2729_v30  ;;  %1966 = vset.pattern.permute.xlu0 %v2716_v1 }
 0x438   :  { %1052 = vperm.xlu1 %1957, %v2500_v19   ;;  %896 = vperm.xlu0 %1966, %v2527_v5  }
 0x43c   :  { %1958 = vset.pattern.permute.xlu1 %v2716_v1  ;;  %1968 = vset.pattern.permute.xlu0 %v2714_v44 }
 0x43d   :  { %881 = vperm.xlu1 %1958, %v2509_v32   ;;  %940 = vperm.xlu0 %1968, %v2527_v5  }
 0x441   :  { %1959 = vset.pattern.permute.xlu1 %v2723_v23  ;;  %1971 = vset.pattern.permute.xlu0 %v2722_v49 }
 0x442   :  { %904 = vperm.xlu1 %1959, %v2509_v32   ;;  %1012 = vperm.xlu0 %1971, %v2527_v5  }
 0x446   :  { %1962 = vset.pattern.permute.xlu1 %v2718_v47  ;;  %1976 = vset.pattern.permute.xlu0 %v2721_v45 }
 0x447   :  { %976 = vperm.xlu1 %1962, %v2509_v32   ;;  %960 = vperm.xlu0 %1976, %v2545_v24  }
 0x44b   :  { %1963 = vset.pattern.permute.xlu1 %v2722_v49  ;;  %1979 = vset.pattern.permute.xlu0 %v2727_v12 }
 0x44c   :  { %1000 = vperm.xlu1 %1963, %v2509_v32   ;;  %1032 = vperm.xlu0 %1979, %v2545_v24  }
 0x450   :  { %1965 = vset.pattern.permute.xlu1 %v2729_v30  ;;  %1981 = vset.pattern.permute.xlu0 %v2729_v30 }
 0x451   :  { %1048 = vperm.xlu1 %1965, %v2509_v32   ;;  %1060 = vperm.xlu0 %1981, %v2527_v5  }
 0x455   :  { %1967 = vset.pattern.permute.xlu1 %v2723_v23  ;;  %1984 = vset.pattern.permute.xlu0 %v2714_v44 }
 0x456   :  { %916 = vperm.xlu1 %1967, %v2527_v5  }
 0x45a   :  { %1969 = vset.pattern.permute.xlu1 %v2721_v45 }
 0x45b   :  { %964 = vperm.xlu1 %1969, %v2527_v5  }
 0x45f   :  { %1970 = vset.pattern.permute.xlu1 %v2718_v47 }
 0x460   :  { %988 = vperm.xlu1 %1970, %v2527_v5  }
 0x464   :  { %1972 = vset.pattern.permute.xlu1 %v2727_v12 }
 0x465   :  { %1036 = vperm.xlu1 %1972, %v2527_v5  }
 0x469   :  { %1973 = vset.pattern.permute.xlu1 %v2716_v1 }
 0x46a   :  { %891 = vperm.xlu1 %1973, %v2545_v24  }
 0x46e   :  { %1974 = vset.pattern.permute.xlu1 %v2723_v23 }
 0x46f   :  { %912 = vperm.xlu1 %1974, %v2545_v24  }
 0x473   :  { %1975 = vset.pattern.permute.xlu1 %v2714_v44 }
 0x474   :  { %936 = vperm.xlu1 %1975, %v2545_v24  }
 0x478   :  { %1977 = vset.pattern.permute.xlu1 %v2718_v47 }
 0x479   :  { %984 = vperm.xlu1 %1977, %v2545_v24  }
 0x47d   :  { %1978 = vset.pattern.permute.xlu1 %v2722_v49 }
 0x47e   :  { %1008 = vperm.xlu1 %1978, %v2545_v24  }
 0x482   :  { %1980 = vset.pattern.permute.xlu1 %v2729_v30 }
 0x483   :  { %1056 = vperm.xlu1 %1980, %v2545_v24  }
 0x487   :  { %1982 = vset.pattern.permute.xlu1 %v2716_v1 }
 0x49e   :  { %v909_v43 = vpop.permute.xlu1 %908  ;;  %v887_v48 = vpop.permute.xlu0 %886 }
 0x49f   :  { %v920_v4 = vmul.f32 %v909_v43, %v2267_v27  ;;  %v900_v52 = vmul.f32 %v887_v48, %v2273_v29 }
 0x4a1   :  { %v924_v58 = vadd.f32 %v920_v4, %v900_v52 }
 0x4a3   :  { %v933_v59 = vpop.permute.xlu1 %932  ;;  %v1005_v21 = vpop.permute.xlu0 %1004 }
 0x4a4   :  { %v944_v60 = vmul.f32 %v933_v59, %v2278_v35  ;;  %v1016_v4 = vmul.f32 %v1005_v21, %v2300_v56 }
 0x4a6   :  { %v948_v17 = vadd.f32 %v944_v60, %v924_v58 }
 0x4a8   :  { %v957_v28 = vpop.permute.xlu1 %956  ;;  %v929_v54 = vpop.permute.xlu0 %928 }
 0x4a9   :  { %v968_v12 = vmul.f32 %v957_v28, %v2286_v40  ;;  %v943_v46 = vmul.f32 %v929_v54, %v2278_v35 }
 0x4ab   :  { %v972_v59 = vadd.f32 %v968_v12, %v948_v17 }
 0x4ad   :  { %v981_v20 = vpop.permute.xlu1 %980  ;;  %v953_v30 = vpop.permute.xlu0 %952 }
 0x4ae   :  { %v992_v44 = vmul.f32 %v981_v20, %v2294_v55  ;;  %v967_v43 = vmul.f32 %v953_v30, %v2286_v40 }
 0x4b0   :  { %v996_v5 = vadd.f32 %v992_v44, %v972_v59 }
 0x4b2   :  { %v1029_v42 = vpop.permute.xlu1 %1028  ;;  %v1025_v52 = vpop.permute.xlu0 %1024 }
 0x4b3   :  { %v1040_v60 = vmul.f32 %v1029_v42, %v2306_v39  ;;  %v1039_v20 = vmul.f32 %v1025_v52, %v2306_v39 }
 0x4b7   :  { %v1053_v31 = vpop.permute.xlu1 %1052 }
 0x4b8   :  { %v1064_v58 = vmul.f32 %v1053_v31, %v2313_v61 }
 0x4bc   :  { %v882_v53 = vpop.permute.xlu1 %881 }
 0x4bd   :  { %v899_v34 = vmul.f32 %v882_v53, %v2273_v29 }
 0x4c1   :  { %v905_v10 = vpop.permute.xlu1 %904 }
 0x4c2   :  { %v919_v13 = vmul.f32 %v905_v10, %v2267_v27 }
 0x4c4   :  { %v923_v38 = vadd.f32 %v919_v13, %v899_v34  ;;  %v1020_v34 = vadd.f32 %v1016_v4, %v996_v5 }
 0x4c6   :  { %v947_v48 = vadd.f32 %v943_v46, %v923_v38  ;;  %v977_v1 = vpop.permute.xlu1 %976  ;;  %v1044_v46 = vadd.f32 %v1040_v60, %v1020_v34 }
 0x4c7   :  { %v991_v53 = vmul.f32 %v977_v1, %v2294_v55 }
 0x4c8   :  { %v971_v47 = vadd.f32 %v967_v43, %v947_v48  ;;  %v1068_v44 = vadd.f32 %v1064_v58, %v1044_v46  ;;  %v897_v43 = vpop.permute.xlu0 %896 }
 0x4c9   :  { %v902_v31 = vmul.f32 %v897_v43, %v2273_v29 }
 0x4ca   :  { %v995_v10 = vadd.f32 %v991_v53, %v971_v47 }
 0x4cb   :  { %v1001_v28 = vpop.permute.xlu1 %1000 }
 0x4cc   :  { %v1015_v54 = vmul.f32 %v1001_v28, %v2300_v56  ;;  %v941_v48 = vpop.permute.xlu0 %940 }
 0x4ce   :  { %v1019_v13 = vadd.f32 %v1015_v54, %v995_v10  ;;  %v946_v54 = vmul.f32 %v941_v48, %v2278_v35 }
 0x4d0   :  { %v1049_v12 = vpop.permute.xlu1 %1048  ;;  %v1043_v30 = vadd.f32 %v1039_v20, %v1019_v13  ;;  %v1013_v4 = vpop.permute.xlu0 %1012 }
 0x4d1   :  { %v1063_v1 = vmul.f32 %v1049_v12, %v2313_v61  ;;  %v1018_v48 = vmul.f32 %v1013_v4, %v2300_v56 }
 0x4d3   :  { %v1067_v21 = vadd.f32 %v1063_v1, %v1043_v30 }
 0x4d4   :  { %v961_v58 = vpop.permute.xlu0 %960 }
 0x4d5   :  { %v917_v38 = vpop.permute.xlu1 %916  ;;  %v1828_v17 = vpack.c.bf16 %v1068_v44, %v1067_v21  ;;  %v969_v21 = vmul.f32 %v961_v58, %v2286_v40 }
 0x4d6   :  { %v922_v53 = vmul.f32 %v917_v38, %v2267_v27 }
 0x4d7   :  { %1829 = vmatprep.subr.bf16.mxu0 %v1828_v17 }
 0x4d8   :  { %1831 = vmatpush3.bf16.msra.mxu0 %v1828_v17  ;;  %v926_v28 = vadd.f32 %v922_v53, %v902_v31  ;;  %v1033_v17 = vpop.permute.xlu0 %1032 }
 0x4da   :  { %v965_v47 = vpop.permute.xlu1 %964  ;;  %v950_v60 = vadd.f32 %v946_v54, %v926_v28 }
 0x4db   :  { %v970_v20 = vmul.f32 %v965_v47, %v2286_v40 }
 0x4dd   :  { %v974_v44 = vadd.f32 %v970_v20, %v950_v60 }
 0x4df   :  { %v989_v5 = vpop.permute.xlu1 %988 }
 0x4e0   :  { %v994_v46 = vmul.f32 %v989_v5, %v2294_v55  ;;  %v1041_v5 = vmul.f32 %v1033_v17, %v2306_v39 }
 0x4e4   :  { %v1037_v42 = vpop.permute.xlu1 %1036 }
 0x4e9   :  { %v892_v59 = vpop.permute.xlu1 %891 }
 0x4ea   :  { %v901_v34 = vmul.f32 %v892_v59, %v2273_v29  ;;  %v1042_v59 = vmul.f32 %v1037_v42, %v2306_v39 }
 0x4ee   :  { %v913_v52 = vpop.permute.xlu1 %912 }
 0x4ef   :  { %v921_v10 = vmul.f32 %v913_v52, %v2267_v27  ;;  %v998_v27 = vadd.f32 %v994_v46, %v974_v44  ;;  %v1061_v52 = vpop.permute.xlu0 %1060 }
 0x4f1   :  { %v925_v12 = vadd.f32 %v921_v10, %v901_v34  ;;  %v1022_v47 = vadd.f32 %v1018_v48, %v998_v27  ;;  %v1066_v34 = vmul.f32 %v1061_v52, %v2313_v61 }
 0x4f3   :  { %v937_v13 = vpop.permute.xlu1 %936  ;;  %v1046_v40 = vadd.f32 %v1042_v59, %v1022_v47 }
 0x4f4   :  { %v945_v30 = vmul.f32 %v937_v13, %v2278_v35 }
 0x4f5   :  { %v1070_v60 = vadd.f32 %v1066_v34, %v1046_v40 }
 0x4f6   :  { %v949_v1 = vadd.f32 %v945_v30, %v925_v12 }
 0x4f8   :  { %v985_v38 = vpop.permute.xlu1 %984  ;;  %v973_v43 = vadd.f32 %v969_v21, %v949_v1 }
 0x4f9   :  { %v993_v29 = vmul.f32 %v985_v38, %v2294_v55  ;;  %v2731_v38 = vmov 0  }
 0x4fb   :  { %v997_v31 = vadd.f32 %v993_v29, %v973_v43 }
 0x4fd   :  { %v1009_v53 = vpop.permute.xlu1 %1008 }
 0x4fe   :  { %v1017_v35 = vmul.f32 %v1009_v53, %v2300_v56 }
 0x500   :  { %v1021_v28 = vadd.f32 %v1017_v35, %v997_v31 }
 0x502   :  { %v1057_v10 = vpop.permute.xlu1 %1056  ;;  %v1045_v54 = vadd.f32 %v1041_v5, %v1021_v28 }
 0x503   :  { %v1065_v55 = vmul.f32 %v1057_v10, %v2313_v61 }
 0x505   :  { %v1069_v4 = vadd.f32 %v1065_v55, %v1045_v54 }
 0x507   :  { %v1832_v20 = vpack.c.bf16 %v1070_v60, %v1069_v4 }
 0x509   :  { %1833 = vmatprep.subr.bf16.mxu0 %v1832_v20 }
 0x50a   :  { %1835 = vmatpush3.bf16.msra.mxu0 %v1832_v20 }
 0x50d   :  { %1771 = vmatmul.mubr.msk.f32.vlgmr.msra.gmra.mrb[4].mxu0 %vm476_vm0, %v2339_v57 }
 0x50e   :  { %1773 = vmatprep.mubr.msk.f32.mxu0 %vm476_vm0, %v2341_v26 }
 0x511   :  { %1774 = vmatmul.mubr.msk.f32.gmra.mrb[6].mxu0 %vm476_vm0, %v2345_v33 }
 0x5e0   :  { %v1772_v56 = vpop.f32.mrb[4].mxu0 }
 0x5e1   :  { %v1143_v39 = vadd.f32 %v1772_v56, %v2361_v16  ;;  %v1137_v42 = vpop.f32.mrb[5].mxu0  ;;  %v2730_v16 = vmov 4  }
 0x5e2   :  { %v1138_v12 = vadd.f32 %v1137_v42, %v2359_v8 }
 0x5e3   :  { %v1157_v13 = vmax.f32 %v1143_v39, 0.0 }
 0x5e4   :  { %v1775_v61 = vpop.f32.mrb[6].mxu0  ;;  %v1156_v1 = vmax.f32 %v1138_v12, 0.0 }
 0x5e5   :  { %v1161_v58 = vadd.f32 %v1157_v13, %v2365_v9  ;;  %v1147_v30 = vpop.f32.mrb[7].mxu0  ;;  %v1153_v26 = vadd.f32 %v1775_v61, %v2369_v15 }
 0x5e6   :  { %v1160_v57 = vadd.f32 %v1156_v1, %v2376_v62  ;;  %v1148_v9 = vadd.f32 %v1147_v30, %v2380_v41  ;;  %v2732_v41 = vmov 2  }
 0x5e7   :  { %v1165_v46 = vmax.f32 %v1161_v58, 0.0  ;;  %v1159_v8 = vmax.f32 %v1153_v26, 0.0 }
 0x5e8   :  { %v1164_v33 = vmax.f32 %v1160_v57, 0.0  ;;  %v1158_v44 = vmax.f32 %v1148_v9, 0.0 }
 0x5e9   :  { %1221 = vperm.xlu0 %1984, %v1165_v46   ;;  %1175 = vperm.xlu1 %1982, %v1165_v46   ;;  %v1163_v62 = vadd.f32 %v1159_v8, %v2389_v37 }
 0x5ea   :  { %v1162_v21 = vadd.f32 %v1158_v44, %v2395_v22 }
 0x5eb   :  { %v1167_v15 = vmax.f32 %v1163_v62, 0.0 }
 0x5ec   :  { %v1166_v27 = vmax.f32 %v1162_v21, 0.0 }
 0x5ed   :  { %1985 = vset.pattern.permute.xlu0 %v2721_v45  ;;  %1983 = vset.pattern.permute.xlu1 %v2723_v23 }
 0x5ee   :  { %1245 = vperm.xlu0 %1985, %v1165_v46   ;;  %1197 = vperm.xlu1 %1983, %v1165_v46  }
 0x5f2   :  { %1989 = vset.pattern.permute.xlu0 %v2723_v23  ;;  %1986 = vset.pattern.permute.xlu1 %v2730_v16 }
 0x5f3   :  { %1269 = vperm.xlu1 %1986, %v1165_v46   ;;  %1193 = vperm.xlu0 %1989, %v1164_v33  }
 0x5f7   :  { %1987 = vset.pattern.permute.xlu1 %v2722_v49  ;;  %1992 = vset.pattern.permute.xlu0 %v2730_v16 }
 0x5f8   :  { %1293 = vperm.xlu1 %1987, %v1165_v46   ;;  %1265 = vperm.xlu0 %1992, %v1164_v33  }
 0x5fc   :  { %1988 = vset.pattern.permute.xlu1 %v2731_v38  ;;  %1997 = vset.pattern.permute.xlu0 %v2721_v45 }
 0x5fd   :  { %1253 = vperm.xlu0 %1997, %v1167_v15   ;;  %1170 = vperm.xlu1 %1988, %v1164_v33  }
 0x601   :  { %2000 = vset.pattern.permute.xlu0 %v2723_v23  ;;  %1990 = vset.pattern.permute.xlu1 %v2732_v41 }
 0x602   :  { %1201 = vperm.xlu0 %2000, %v1166_v27   ;;  %1217 = vperm.xlu1 %1990, %v1164_v33  }
 0x606   :  { %2003 = vset.pattern.permute.xlu0 %v2730_v16  ;;  %1991 = vset.pattern.permute.xlu1 %v2721_v45 }
 0x607   :  { %1273 = vperm.xlu0 %2003, %v1166_v27   ;;  %1241 = vperm.xlu1 %1991, %v1164_v33  }
 0x60b   :  { %2005 = vset.pattern.permute.xlu0 %v2722_v49  ;;  %1993 = vset.pattern.permute.xlu1 %v2722_v49 }
 0x60c   :  { %1301 = vperm.xlu0 %2005, %v1167_v15   ;;  %1289 = vperm.xlu1 %1993, %v1164_v33  }
 0x610   :  { %1994 = vset.pattern.permute.xlu1 %v2731_v38 }
 0x611   :  { %1185 = vperm.xlu1 %1994, %v1167_v15  }
 0x615   :  { %1995 = vset.pattern.permute.xlu1 %v2723_v23 }
 0x616   :  { %1205 = vperm.xlu1 %1995, %v1167_v15  }
 0x61a   :  { %1996 = vset.pattern.permute.xlu1 %v2732_v41 }
 0x61b   :  { %1229 = vperm.xlu1 %1996, %v1167_v15  }
 0x61f   :  { %1998 = vset.pattern.permute.xlu1 %v2730_v16 }
 0x620   :  { %1277 = vperm.xlu1 %1998, %v1167_v15  }
 0x624   :  { %1999 = vset.pattern.permute.xlu1 %v2731_v38 }
 0x625   :  { %1180 = vperm.xlu1 %1999, %v1166_v27  }
 0x629   :  { %2001 = vset.pattern.permute.xlu1 %v2732_v41 }
 0x62a   :  { %1225 = vperm.xlu1 %2001, %v1166_v27  }
 0x62e   :  { %2002 = vset.pattern.permute.xlu1 %v2721_v45 }
 0x62f   :  { %1249 = vperm.xlu1 %2002, %v1166_v27  }
 0x633   :  { %2004 = vset.pattern.permute.xlu1 %v2722_v49 }
 0x634   :  { %1297 = vperm.xlu1 %2004, %v1166_v27  }
 0x668   :  { %v1176_v37 = vpop.permute.xlu1 %1175  ;;  %v1222_v17 = vpop.permute.xlu0 %1221 }
 0x669   :  { %v1189_v59 = vmul.f32 %v1176_v37, %v2438_v2  ;;  %v1233_v5 = vmul.f32 %v1222_v17, %v2441_v6 }
 0x66d   :  { %v1198_v23 = vpop.permute.xlu1 %1197  ;;  %v1246_v29 = vpop.permute.xlu0 %1245 }
 0x66e   :  { %v1209_v48 = vmul.f32 %v1198_v23, %v2435_v3  ;;  %v1257_v10 = vmul.f32 %v1246_v29, %v2447_v25 }
 0x670   :  { %v1213_v53 = vadd.f32 %v1209_v48, %v1189_v59 }
 0x672   :  { %v1270_v22 = vpop.permute.xlu1 %1269  ;;  %v1194_v31 = vpop.permute.xlu0 %1193  ;;  %v1237_v28 = vadd.f32 %v1233_v5, %v1213_v53 }
 0x673   :  { %v1208_v49 = vmul.f32 %v1194_v31, %v2435_v3  ;;  %v1281_v20 = vmul.f32 %v1270_v22, %v2454_v7 }
 0x674   :  { %v1261_v4 = vadd.f32 %v1257_v10, %v1237_v28 }
 0x676   :  { %v1285_v58 = vadd.f32 %v1281_v20, %v1261_v4 }
 0x677   :  { %v1294_v43 = vpop.permute.xlu1 %1293  ;;  %v1266_v54 = vpop.permute.xlu0 %1265 }
 0x678   :  { %v1280_v56 = vmul.f32 %v1266_v54, %v2454_v7  ;;  %v1305_v42 = vmul.f32 %v1294_v43, %v2460_v50  ;;  %v2057_v54 = vmov 0.0  }
 0x679   :  { %1486 = vmatprep.mubr.f32.mxu0 %v2057_v54 }
 0x67a   :  { %v1309_v30 = vadd.f32 %v1305_v42, %v1285_v58 }
 0x67c   :  { %v1171_v47 = vpop.permute.xlu1 %1170  ;;  %v1254_v16 = vpop.permute.xlu0 %1253 }
 0x67d   :  { %v1188_v35 = vmul.f32 %v1171_v47, %v2438_v2  ;;  %v1259_v43 = vmul.f32 %v1254_v16, %v2447_v25  ;;  %v2060_v16 = vmov 11  }
 0x67f   :  { %v1212_v40 = vadd.f32 %v1208_v49, %v1188_v35 }
 0x681   :  { %v1218_v45 = vpop.permute.xlu1 %1217  ;;  %v1202_v44 = vpop.permute.xlu0 %1201 }
 0x682   :  { %v1232_v52 = vmul.f32 %v1218_v45, %v2441_v6  ;;  %v1210_v23 = vmul.f32 %v1202_v44, %v2435_v3 }
 0x684   :  { %v1236_v55 = vadd.f32 %v1232_v52, %v1212_v40 }
 0x686   :  { %v1242_v34 = vpop.permute.xlu1 %1241  ;;  %v1274_v22 = vpop.permute.xlu0 %1273 }
 0x687   :  { %v1256_v60 = vmul.f32 %v1242_v34, %v2447_v25  ;;  %v1282_v35 = vmul.f32 %v1274_v22, %v2454_v7 }
 0x689   :  { %v1260_v39 = vadd.f32 %v1256_v60, %v1236_v55 }
 0x68b   :  { %v1284_v13 = vadd.f32 %v1280_v56, %v1260_v39  ;;  %v1290_v61 = vpop.permute.xlu1 %1289 }
 0x68c   :  { %v1304_v12 = vmul.f32 %v1290_v61, %v2460_v50 }
 0x68e   :  { %v1308_v46 = vadd.f32 %v1304_v12, %v1284_v13 }
 0x690   :  { %v1186_v1 = vpop.permute.xlu1 %1185  ;;  %v1836_v57 = vpack.c.bf16 %v1309_v30, %v1308_v46  ;;  %v2058_v30 = vmov 9   ;;  %v2013_v46 = vld [vmem:[#allocation2 + $0x28] sm:$0xff] }
 0x691   :  { %v1191_v15 = vmul.f32 %v1186_v1, %v2438_v2  ;;  %2006 = vset.pattern.permute.xlu1 %v2058_v30  ;;  %2007 = vset.pattern.permute.xlu0 %v2058_v30  ;;  %v2014_v1 = vld [vmem:[#allocation2 + $0x18] sm:$0xff] }
 0x692   :  { %1837 = vmatprep.subr.bf16.mxu1 %v1836_v57  ;;  %1520 = vperm.xlu0 %2007, %v2013_v46  }
 0x693   :  { %1839 = vmatpush3.bf16.msra.mxu1 %v1836_v57  ;;  %v2059_v57 = vmov 10  }
 0x695   :  { %v1206_v26 = vpop.permute.xlu1 %1205 }
 0x696   :  { %v1211_v9 = vmul.f32 %v1206_v26, %v2435_v3  ;;  %2009 = vset.pattern.permute.xlu0 %v2059_v57  ;;  %v33_v26 = vld [vmem:[#allocation2 + $0x8] ss:$0 sm:$0xff] }
 0x697   :  { %1630 = vperm.xlu0 %2009, %v2014_v1  }
 0x698   :  { %v1215_v38 = vadd.f32 %v1211_v9, %v1191_v15 }
 0x69a   :  { %v1230_v33 = vpop.permute.xlu1 %1229 }
 0x69b   :  { %v1235_v21 = vmul.f32 %v1230_v33, %v2441_v6  ;;  %v2015_v33 = vld [vmem:[#allocation2 + $0x38] sm:$0xff]  ;;  %2010 = vset.pattern.permute.xlu0 %v2060_v16 }
 0x69c   :  { %1656 = vperm.xlu0 %2010, %v33_v26  }
 0x69d   :  { %v1239_v37 = vadd.f32 %v1235_v21, %v1215_v38 }
 0x69f   :  { %v1278_v8 = vpop.permute.xlu1 %1277  ;;  %v1263_v48 = vadd.f32 %v1259_v43, %v1239_v37  ;;  %v2017_v43 = vld [vmem:[#allocation2 + $0x20] sm:$0xff] }
 0x6a0   :  { %v1283_v47 = vmul.f32 %v1278_v8, %v2454_v7  ;;  %v36_v7 = vld [vmem:[#allocation2 + $0x60] sm:$0xff] }
 0x6a2   :  { %v1287_v5 = vadd.f32 %v1283_v47, %v1263_v48 }
 0x6a4   :  { %v1181_v62 = vpop.permute.xlu1 %1180 }
 0x6a5   :  { %v1190_v27 = vmul.f32 %v1181_v62, %v2438_v2  ;;  %v1302_v2 = vpop.permute.xlu0 %1301 }
 0x6a6   :  { %v1307_v52 = vmul.f32 %v1302_v2, %v2460_v50 }
 0x6a7   :  { %v1214_v29 = vadd.f32 %v1210_v23, %v1190_v27 }
 0x6a8   :  { %v1311_v28 = vadd.f32 %v1307_v52, %v1287_v5 }
 0x6a9   :  { %v1226_v41 = vpop.permute.xlu1 %1225 }
 0x6aa   :  { %v1234_v17 = vmul.f32 %v1226_v41, %v2441_v6 }
 0x6ac   :  { %v1238_v53 = vadd.f32 %v1234_v17, %v1214_v29  ;;  %v2016_v17 = vld [vmem:[#allocation2 + $0x10] sm:$0xff] }
 0x6ad   :  { %v2018_v29 = vld [vmem:[#allocation2 + $0x30] sm:$0xff] }
 0x6ae   :  { %v1250_v59 = vpop.permute.xlu1 %1249 }
 0x6af   :  { %v1258_v31 = vmul.f32 %v1250_v59, %v2447_v25  ;;  %v37_v25 = vld [vmem:[#allocation2 + $0x68] sm:$0xff] }
 0x6b0   :  { %1422 = vmatprep.subr.mxu0 %v37_v25 }
 0x6b1   :  { %v1262_v45 = vadd.f32 %v1258_v31, %v1238_v53  ;;  %1423 = vmatpush1.msra.mxu0 %v36_v7 }
 0x6b3   :  { %v1286_v49 = vadd.f32 %v1282_v35, %v1262_v45  ;;  %v1298_v3 = vpop.permute.xlu1 %1297 }
 0x6b4   :  { %v1306_v6 = vmul.f32 %v1298_v3, %v2460_v50 }
 0x6b6   :  { %v1310_v40 = vadd.f32 %v1306_v6, %v1286_v49 }
 0x6b8   :  { %v1840_v10 = vpack.c.bf16 %v1311_v28, %v1310_v40 }
 0x6ba   :  { %1841 = vmatprep.subr.bf16.mxu1 %v1840_v10 }
 0x6bb   :  { %1843 = vmatpush3.bf16.msra.mxu1 %v1840_v10 }
 0x6be   :  { %1785 = vmatmul.mubr.msk.f32.vlgmr.msra.gmra.mrb[4].mxu1 %vm476_vm0, %v2480_v11 }
 0x6bf   :  { %1787 = vmatprep.mubr.msk.f32.mxu1 %vm476_vm0, %v2482_v0 }
 0x6c2   :  { %1788 = vmatmul.mubr.msk.f32.gmra.mrb[6].mxu1 %vm476_vm0, %v2486_v36 }
 0x711   :  { %v1521_v53 = vpop.permute.xlu0 %1520 }
 0x716   :  { %v1631_v49 = vpop.permute.xlu0 %1630 }
 0x791   :  { %v1786_v50 = vpop.f32.mrb[4].mxu1 }
 0x792   :  { %v1384_v34 = vadd.f32 %v1786_v50, %v2493_v63  ;;  %v1378_v55 = vpop.f32.mrb[5].mxu1 }
 0x793   :  { %v1379_v60 = vadd.f32 %v1378_v55, %v2496_v51 }
 0x794   :  { %v1398_v4 = vmax.f32 %v1384_v34, 0.0 }
 0x795   :  { %v1397_v11 = vmax.f32 %v1379_v60, 0.0  ;;  %v1789_v20 = vpop.f32.mrb[6].mxu1 }
 0x796   :  { %v1388_v56 = vpop.f32.mrb[7].mxu1  ;;  %v1402_v39 = vadd.f32 %v1398_v4, %v2500_v19  ;;  %v1394_v13 = vadd.f32 %v1789_v20, %v2511_v18  ;;  %v2011_v18 = vld [vmem:[#allocation2] sm:$0xff] }
 0x797   :  { %v1401_v0 = vadd.f32 %v1397_v11, %v2509_v32  ;;  %v1389_v36 = vadd.f32 %v1388_v56, %v2531_v14  ;;  %v2733_v32 = vld [vmem:[#allocation5_spill] sm:$0xff]  ;;  %1806 = vmatprep.mubr.msk.f32.mxu1 %vm1527_vm2, %v2011_v18 }
 0x798   :  { %v1406_v63 = vmax.f32 %v1402_v39, 0.0  ;;  %v1400_v51 = vmax.f32 %v1394_v13, 0.0 }
 0x799   :  { %v1405_v42 = vmax.f32 %v1401_v0, 0.0  ;;  %v1399_v61 = vmax.f32 %v1389_v36, 0.0 }
 0x79a   :  { %v1404_v12 = vadd.f32 %v1400_v51, %v2733_v32 }
 0x79b   :  { %1682 = vmatmul.mubr.msk.f32.vlgmr.msra.gmra.mrb[8].mxu0 %vm1409_vm1, %v1405_v42  ;;  %v1403_v58 = vadd.f32 %v1399_v61, %v2545_v24  ;;  %v2012_v24 = vld [vmem:[#allocation2 + $0x8] sm:$0xff]  ;;  %v1657_v61 = vpop.permute.xlu0 %1656 }
 0x79c   :  { %1492 = vmatprep.mubr.f32.mxu0 %v2057_v54  ;;  %v1408_v19 = vmax.f32 %v1404_v12, 0.0  ;;  %1512 = vperm.xlu1 %2006, %v2012_v24  }
 0x79d   :  { %v1407_v14 = vmax.f32 %v1403_v58, 0.0 }
 0x79f   :  { %1683 = vmatmul.mubr.msk.f32.gmra.mrb[10].mxu0 %vm1409_vm1, %v1406_v63 }
 0x7a0   :  { %1498 = vmatprep.mubr.f32.mxu0 %v2057_v54  ;;  %1516 = vperm.xlu1 %2006, %v2014_v1  }
 0x7a3   :  { %1684 = vmatmul.mubr.msk.f32.gmra.mrb[12].mxu0 %vm1409_vm1, %v1407_v14 }
 0x7a4   :  { %1504 = vmatprep.mubr.f32.mxu0 %v2057_v54  ;;  %1524 = vperm.xlu1 %2006, %v2015_v33  }
 0x7a7   :  { %1685 = vmatmul.mubr.msk.f32.gmra.mrb[14].mxu0 %vm1409_vm1, %v1408_v19 }
 0x7a8   :  { %2008 = vset.pattern.permute.xlu1 %v2059_v57 }
 0x7a9   :  { %1626 = vperm.xlu1 %2008, %v2012_v24  }
 0x7ad   :  { %1634 = vperm.xlu1 %2008, %v2013_v46  }
 0x7b1   :  { %1638 = vperm.xlu1 %2008, %v2015_v33  }
 0x81b   :  { %v1513_v48 = vpop.permute.xlu1 %1512 }
 0x81f   :  { %v1517_v47 = vpop.permute.xlu1 %1516 }
 0x823   :  { %v1525_v59 = vpop.permute.xlu1 %1524 }
 0x828   :  { %v1627_v31 = vpop.permute.xlu1 %1626 }
 0x82c   :  { %v1635_v28 = vpop.permute.xlu1 %1634 }
 0x830   :  { %v1639_v4 = vpop.permute.xlu1 %1638 }
 0x86e   :  { %v1488_v8 = vpop.f32.mrb[8].mxu0 }
 0x86f   :  { %v1490_v9 = vpop.f32.mrb[9].mxu0 }
 0x872   :  { %v1494_v62 = vpop.f32.mrb[10].mxu0 }
 0x873   :  { %v1844_v44 = vpack.c.bf16 %v1494_v62, %v1488_v8  ;;  %v1496_v15 = vpop.f32.mrb[11].mxu0 }
 0x874   :  { %v1852_v21 = vpack.c.bf16 %v1496_v15, %v1490_v9 }
 0x875   :  { %1845 = vmatprep.subr.bf16.mxu1 %v1844_v44 }
 0x876   :  { %v1500_v38 = vpop.f32.mrb[12].mxu0  ;;  %1847 = vmatpush3.bf16.msra.mxu1 %v1844_v44 }
 0x877   :  { %v1502_v27 = vpop.f32.mrb[13].mxu0 }
 0x87a   :  { %v1506_v41 = vpop.f32.mrb[14].mxu0 }
 0x87b   :  { %v1848_v37 = vpack.c.bf16 %v1506_v41, %v1500_v38  ;;  %v1508_v23 = vpop.f32.mrb[15].mxu0 }
 0x87c   :  { %v1856_v22 = vpack.c.bf16 %v1508_v23, %v1502_v27 }
 0x87d   :  { %1849 = vmatprep.subr.bf16.mxu1 %v1848_v37 }
 0x87e   :  { %1851 = vmatpush3.bf16.msra.mxu1 %v1848_v37 }
 0x87f   :  { %1853 = vmatprep.subr.bf16.mxu1 %v1852_v21 }
 0x882   :  { %1855 = vmatpush3.bf16.msra.mxu1 %v1852_v21 }
 0x883   :  { %1857 = vmatprep.subr.bf16.mxu1 %v1856_v22 }
 0x886   :  { %1859 = vmatpush3.bf16.msra.mxu1 %v1856_v22 }
 0x889   :  { %1807 = vmatmul.mubr.msk.f32.vlgmr.msra.gmra.mrb[8].mxu1 %vm1527_vm2, %v2016_v17 }
 0x88a   :  { %1809 = vmatprep.mubr.msk.f32.mxu1 %vm1527_vm2, %v2017_v43 }
 0x88d   :  { %1810 = vmatmul.mubr.msk.f32.gmra.mrb[10].mxu1 %vm1527_vm2, %v2018_v29 }
 0x95c   :  { %v1808_v35 = vpop.f32.mrb[8].mxu1 }
 0x95d   :  { %v1608_v2 = vadd.f32 %v1808_v35, %v1517_v47  ;;  %v1602_v45 = vpop.f32.mrb[9].mxu1 }
 0x95e   :  { %v1603_v5 = vadd.f32 %v1602_v45, %v1513_v48 }
 0x95f   :  { %v1622_v3 = vmax.f32 %v1608_v2, 0.0 }
 0x960   :  { %v1621_v52 = vmax.f32 %v1603_v5, 0.0  ;;  %v1811_v6 = vpop.f32.mrb[10].mxu1 }
 0x961   :  { %v1642_v40 = vmul.f32 %v1631_v49, %v1622_v3  ;;  %v1618_v10 = vadd.f32 %v1811_v6, %v1525_v59  ;;  %v1612_v25 = vpop.f32.mrb[11].mxu1 }
 0x962   :  { %v1641_v7 = vmul.f32 %v1627_v31, %v1621_v52  ;;  %v1613_v54 = vadd.f32 %v1612_v25, %v1521_v53 }
 0x963   :  { %v1624_v34 = vmax.f32 %v1618_v10, 0.0 }
 0x964   :  { %v1645_v50 = vadd.f32 %v1642_v40, %v1641_v7  ;;  %v1623_v55 = vmax.f32 %v1613_v54, 0.0 }
 0x965   :  { %v1644_v11 = vmul.f32 %v1639_v4, %v1624_v34 }
 0x966   :  { %v1643_v60 = vmul.f32 %v1635_v28, %v1623_v55 }
 0x968   :  { %v1646_v20 = vadd.f32 %v1645_v50, %v1643_v60 }
 0x96a   :  { %v1647_v56 = vadd.f32 %v1646_v20, %v1644_v11 }
 0x96c   :  { %v1648_v0 = vrot.slane %v1647_v56, 4 }
 0x96e   :  { %v1649_v36 = vadd.f32 %v1648_v0, %v1647_v56 }
 0x970   :  { %v1650_v39 = vrot.slane %v1649_v36, 2 }
 0x972   :  { %v1651_v42 = vadd.f32 %v1650_v39, %v1649_v36 }
 0x974   :  { %v1652_v13 = vrot.slane %v1651_v42, 1 }
 0x976   :  { %v1653_v63 = vadd.f32 %v1652_v13, %v1651_v42 }
 0x978   :  { %v1659_v51 = vadd.f32 %v1657_v61, %v1653_v63 }
 0x97a   :  { %1660 = vst [vmem:[%s2700_s2] sm:$0xff] %v1659_v51 }
 0x97b   :  { %1665 = vsyncpa [#allocation3], 1 }

</bundles_post_ra>
